<compile_context>
chip_gen: v7x
topology: tpu7x:2x2x1
jax: 0.10.0
libtpu: 0.0.40
codegen_flags: <defaults>
</compile_context>

<pallas_src>
import functools

import jax
import jax.numpy as jnp
import numpy as np
from jax import lax
from jax.experimental import pallas as pl
from jax.experimental.pallas import tpu as pltpu


# --------------------------- recurrent Pallas kernel ---------------------------
def _bilstm_rec_kernel(gx_ref, whh_ref, out_ref, h_st, c_st, *, unroll):
    """One time-chunk grid step; BOTH directions advanced together per timestep.

    gx_ref : (2, TC*B, 4H)  precomputed x @ W_ih + bias.  dir 0 = forward in time
                            order; dir 1 = backward, stored time-REVERSED so both
                            directions walk local rows s = 0..TC-1 identically.
    whh_ref: (2, H, 4H)     recurrent weights (constant block across the grid).
    out_ref: (2, TC*B, H)   hidden states (dir-1 rows are in reversed-time order).
    h_st, c_st: (2, B, H)   f32 recurrent state, carried across chunks (grid axis 0).
    """
    B, H = h_st.shape[1], h_st.shape[2]
    TC = gx_ref.shape[1] // B
    c = pl.program_id(0)

    # Reset both directions' state at the start of the timeline.
    @pl.when(c == 0)
    def _():
        h_st[...] = jnp.zeros_like(h_st)
        c_st[...] = jnp.zeros_like(c_st)

    whh = whh_ref[...]            # (2, H, 4H), hoisted out of the serial loop

    def step(s, carry):
        r = s * B
        gx = gx_ref[:, pl.ds(r, B), :]                           # (2, B, 4H)
        # One batched MXU matmul advances both independent recurrences; their
        # latencies hide each other on the serial critical path.
        gates = gx + jnp.einsum("dbh,dhg->dbg", h_st[...], whh,
                                preferred_element_type=jnp.float32)
        # Gate layout [i, f, o, g]: one sigmoid over 3H lanes + one tanh over H lanes.
        sig = jax.nn.sigmoid(gates[..., :3 * H])
        g = jnp.tanh(gates[..., 3 * H:])
        c_new = sig[..., H:2 * H] * c_st[...] + sig[..., :H] * g
        h_new = sig[..., 2 * H:3 * H] * jnp.tanh(c_new)
        c_st[...] = c_new
        h_st[...] = h_new
        out_ref[:, pl.ds(r, B), :] = h_new.astype(out_ref.dtype)
        return carry

    lax.fori_loop(0, TC, step, 0, unroll=unroll)


# --------------------------------- wrapper --------------------------------------
def encoder_layer(x, params, *, t_chunk=None):
    """x: (T, B, D) float32.  params = (wih (2,D,4H), whh (2,H,4H), bias (2,4H)).
    Returns (T, B, 2H) — forward hidden states in [..., :H], backward in [..., H:]."""
    T, B, D = x.shape
    wih, whh, bias = params
    H = whh.shape[1]
    G = 4 * H

    # Chunk size: whole sequence if small, else a fixed 32 with zero-padded tail.
    if t_chunk is None:
        t_chunk = min(T, 32)
    nc = (T + t_chunk - 1) // t_chunk
    Tp = nc * t_chunk

    # (1) Hoist the input projection + bias out of the serial recurrence: one big
    #     (T*B, D) @ (D, 4H) MXU matmul per direction, done by XLA before the kernel.
    #     Direction 1 is built from the time-reversed input so the kernel can walk
    #     both directions with identical indexing.
    xf = x.reshape(T * B, D).astype(jnp.float32)
    xb = x[::-1].reshape(T * B, D).astype(jnp.float32)
    gx_f = xf @ wih[0] + bias[0]                              # (T*B, 4H)
    gx_b = xb @ wih[1] + bias[1]                              # (T*B, 4H), time-reversed
    gx = jnp.stack([gx_f, gx_b])                              # (2, T*B, 4H)
    if Tp != T:
        # Padding goes at the END of both arrays, i.e. it is processed LAST by both
        # recurrences, so it never corrupts the state feeding the real timesteps.
        gx = jnp.pad(gx, ((0, 0), (0, (Tp - T) * B), (0, 0)))

    # (2) Explicit, shape-derived scoped-VMEM budget (capped for v7x's 64 MiB VMEM).
    by = 4  # f32
    blk_gx = 2 * t_chunk * B * G * by
    blk_out = 2 * t_chunk * B * H * by
    blk_whh = 2 * H * G * by
    scratch = 2 * (2 * B * H * by)
    need = 2 * (blk_gx + blk_out) + 2 * blk_whh + scratch     # double-buffered blocks
    vmem_limit = int(min(max(2 * need, 16 << 20), 64 << 20))

    # (3) Cap the inner unroll at real H so gates vregs don't spill; full unroll is
    #     fine (and fastest) at toy H.
    unroll = True if H < 128 else 8

    out = pl.pallas_call(
        functools.partial(_bilstm_rec_kernel, unroll=unroll),
        out_shape=jax.ShapeDtypeStruct((2, Tp * B, H), x.dtype),
        grid_spec=pltpu.PrefetchScalarGridSpec(
            num_scalar_prefetch=0,
            grid=(nc,),                                   # time chunks only
            in_specs=[
                pl.BlockSpec((2, t_chunk * B, G), lambda c: (0, c, 0)),
                pl.BlockSpec((2, H, G), lambda c: (0, 0, 0)),   # constant block
            ],
            out_specs=pl.BlockSpec((2, t_chunk * B, H), lambda c: (0, c, 0)),
            scratch_shapes=[pltpu.VMEM((2, B, H), jnp.float32),   # h state (both dirs)
                            pltpu.VMEM((2, B, H), jnp.float32)],  # c state (both dirs)
        ),
        compiler_params=pltpu.CompilerParams(
            dimension_semantics=("arbitrary",),           # chunk axis carries state
            vmem_limit_bytes=vmem_limit),
    )(gx, whh)

    # Un-pad, un-flatten, un-reverse direction 1, and concatenate.  XLA fuses the
    # reverse into the concatenate (single pass over the kernel output).
    out_f = out[0, :T * B].reshape(T, B, H)
    out_b = out[1, :T * B].reshape(T, B, H)[::-1]
    return jnp.concatenate([out_f, out_b], axis=-1)


# --------------------- pure-JAX reference (for verification) ---------------------
def encoder_layer_ref(x, params):
    wih, whh, bias = params
    H = whh.shape[1]

    def run_dir(xs, w_ih, w_hh, b):
        B = xs.shape[1]

        def step(carry, xt):
            h, c = carry
            gates = xt @ w_ih + h @ w_hh + b          # gate order [i, f, o, g]
            i = jax.nn.sigmoid(gates[:, :H])
            f = jax.nn.sigmoid(gates[:, H:2 * H])
            o = jax.nn.sigmoid(gates[:, 2 * H:3 * H])
            g = jnp.tanh(gates[:, 3 * H:])
            c = f * c + i * g
            h = o * jnp.tanh(c)
            return (h, c), h

        init = (jnp.zeros((B, H), jnp.float32), jnp.zeros((B, H), jnp.float32))
        _, ys = lax.scan(step, init, xs)
        return ys

    out_f = run_dir(x, wih[0], whh[0], bias[0])
    out_b = run_dir(x[::-1], wih[1], whh[1], bias[1])[::-1]
    return jnp.concatenate([out_f, out_b], axis=-1)


# --------------------------------- parameters ------------------------------------
def init_params(key, input_size, hidden_size):
    """Mimics PyTorch nn.LSTM init: U(-1/sqrt(H), 1/sqrt(H)).
    Weights stored transposed ((D,4H)/(H,4H)) so the kernel does x @ W, the two
    PyTorch biases are pre-summed, and gates are packed [i, f, o, g].
    NOTE: real PyTorch nn.LSTM weights use gate order [i, f, g, o] — permute before
    loading them into this format, otherwise results silently diverge from torch."""
    H, D, G = hidden_size, input_size, 4 * hidden_size
    k = 1.0 / np.sqrt(H)
    keys = jax.random.split(key, 8)

    def u(kk, shape):
        return jax.random.uniform(kk, shape, jnp.float32, minval=-k, maxval=k)

    wih = jnp.stack([u(keys[0], (D, G)), u(keys[4], (D, G))])              # (2, D, 4H)
    whh = jnp.stack([u(keys[1], (H, G)), u(keys[5], (H, G))])              # (2, H, 4H)
    bias = jnp.stack([u(keys[2], (G,)) + u(keys[3], (G,)),
                      u(keys[6], (G,)) + u(keys[7], (G,))])                # (2, 4H)
    return (wih, whh, bias)


if __name__ == "__main__":
    T, B, D, H = 8, 2, 16, 32   # seq_len, batch, input_size, hidden_size

    key = jax.random.PRNGKey(0)
    kx, kp = jax.random.split(key)
    x = jax.random.normal(kx, (T, B, D), jnp.float32)
    params = init_params(kp, D, H)

    out = jax.block_until_ready(encoder_layer(x, params))
    ref = jax.block_until_ready(encoder_layer_ref(x, params))

    assert out.shape == (T, B, 2 * H), out.shape
    np.testing.assert_allclose(np.asarray(out), np.asarray(ref), rtol=1e-5, atol=1e-5)

    print("KERNEL_OK")
</pallas_src>

<mosaic_0001>
module attributes {stable_mosaic.version = 11 : i64} {
  func.func @_bilstm_rec_kernel(%arg0: i32, %arg1: memref<2x16x128xf32, #tpu.memory_space<vmem>>, %arg2: memref<2x32x128xf32, #tpu.memory_space<vmem>>, %arg3: memref<2x16x32xf32, #tpu.memory_space<vmem>>, %arg4: memref<2x2x32xf32, #tpu.memory_space<vmem>>, %arg5: memref<2x2x32xf32, #tpu.memory_space<vmem>>) attributes {dimension_semantics = [#tpu.dimension_semantics<arbitrary>], iteration_bounds = array<i64: 1>, scalar_prefetch = 0 : i64, scratch_operands = 2 : i64, tpu.core_type = #tpu.core_type<tc>, window_params = [{transform_indices = @transform_0, window_bounds = array<i64: 2, 16, 128>}, {pipeline_mode = #tpu.pipeline_mode<synchronous>, transform_indices = @transform_1, window_bounds = array<i64: 2, 32, 128>}, {transform_indices = @transform_2, window_bounds = array<i64: 2, 16, 32>}]} {
    %c0_i32 = arith.constant 0 : i32
    %0 = arith.cmpi eq, %arg0, %c0_i32 : i32
    %1 = arith.extui %0 : i1 to i32
    %c0_i32_0 = arith.constant 0 : i32
    %2 = arith.cmpi ne, %1, %c0_i32_0 : i32
    scf.if %2 {
      %cst_155 = arith.constant 0.000000e+00 : f32
      %220 = vector.broadcast %cst_155 : f32 to vector<2x2x32xf32>
      %c0_156 = arith.constant 0 : index
      %c0_157 = arith.constant 0 : index
      %c0_158 = arith.constant 0 : index
      %221 = vector.load %arg4[%c0_156, %c0_157, %c0_158] : memref<2x2x32xf32, #tpu.memory_space<vmem>>, vector<2x2x32xf32>
      tpu.vector_store %arg4[%c0_156, %c0_157, %c0_158], %220 {strides = array<i32>} : memref<2x2x32xf32, #tpu.memory_space<vmem>>, vector<2x2x32xf32>,
      %cst_159 = arith.constant 0.000000e+00 : f32
      %222 = vector.broadcast %cst_159 : f32 to vector<2x2x32xf32>
      %c0_160 = arith.constant 0 : index
      %c0_161 = arith.constant 0 : index
      %c0_162 = arith.constant 0 : index
      %223 = vector.load %arg5[%c0_160, %c0_161, %c0_162] : memref<2x2x32xf32, #tpu.memory_space<vmem>>, vector<2x2x32xf32>
      tpu.vector_store %arg5[%c0_160, %c0_161, %c0_162], %222 {strides = array<i32>} : memref<2x2x32xf32, #tpu.memory_space<vmem>>, vector<2x2x32xf32>,
    } else {
    }
    %c0 = arith.constant 0 : index
    %c0_1 = arith.constant 0 : index
    %c0_2 = arith.constant 0 : index
    %3 = vector.load %arg2[%c0, %c0_1, %c0_2] : memref<2x32x128xf32, #tpu.memory_space<vmem>>, vector<2x32x128xf32>
    %c0_i32_3 = arith.constant 0 : i32
    %c2_i32 = arith.constant 2 : i32
    %4 = arith.muli %c0_i32_3, %c2_i32 : i32
    %c0_4 = arith.constant 0 : index
    %5 = arith.index_cast %4 : i32 to index
    %c0_5 = arith.constant 0 : index
    %6 = vector.load %arg1[%c0_4, %5, %c0_5] : memref<2x16x128xf32, #tpu.memory_space<vmem>>, vector<2x2x128xf32>
    %c0_6 = arith.constant 0 : index
    %c0_7 = arith.constant 0 : index
    %c0_8 = arith.constant 0 : index
    %7 = vector.load %arg4[%c0_6, %c0_7, %c0_8] : memref<2x2x32xf32, #tpu.memory_space<vmem>>, vector<2x2x32xf32>
    "tpu.trace_start"() <{level = 10 : i32, message = "dbh,dhg->dbg"}> : () -> ()
    %cst = arith.constant dense<0.000000e+00> : vector<2x2x128xf32>
    %8 = tpu.matmul %7, %3, %cst {dimension_numbers = #tpu.dot_dimension_numbers<[2], [1], [1], [2], [0, 0, 0, 1, 1, 2], [0], [0]>} : vector<2x2x32xf32>, vector<2x32x128xf32>, vector<2x2x128xf32> -> vector<2x2x128xf32>
    "tpu.trace_stop"() : () -> ()
    %9 = arith.addf %6, %8 : vector<2x2x128xf32>
    %10 = vector.extract_strided_slice %9 {offsets = [0, 0, 0], sizes = [2, 2, 96], strides = [1, 1, 1]} : vector<2x2x128xf32> to vector<2x2x96xf32>
    %11 = arith.negf %10 : vector<2x2x96xf32>
    %12 = math.exp %11 : vector<2x2x96xf32>
    %cst_9 = arith.constant 1.000000e+00 : f32
    %13 = vector.broadcast %cst_9 : f32 to vector<2x2x96xf32>
    %14 = arith.addf %13, %12 : vector<2x2x96xf32>
    %15 = arith.divf %13, %14 : vector<2x2x96xf32>
    %16 = vector.extract_strided_slice %9 {offsets = [0, 0, 96], sizes = [2, 2, 32], strides = [1, 1, 1]} : vector<2x2x128xf32> to vector<2x2x32xf32>
    %17 = math.tanh %16 : vector<2x2x32xf32>
    %18 = vector.extract_strided_slice %15 {offsets = [0, 0, 32], sizes = [2, 2, 32], strides = [1, 1, 1]} : vector<2x2x96xf32> to vector<2x2x32xf32>
    %c0_10 = arith.constant 0 : index
    %c0_11 = arith.constant 0 : index
    %c0_12 = arith.constant 0 : index
    %19 = vector.load %arg5[%c0_10, %c0_11, %c0_12] : memref<2x2x32xf32, #tpu.memory_space<vmem>>, vector<2x2x32xf32>
    %20 = arith.mulf %18, %19 : vector<2x2x32xf32>
    %21 = vector.extract_strided_slice %15 {offsets = [0, 0, 0], sizes = [2, 2, 32], strides = [1, 1, 1]} : vector<2x2x96xf32> to vector<2x2x32xf32>
    %22 = arith.mulf %21, %17 : vector<2x2x32xf32>
    %23 = arith.addf %20, %22 : vector<2x2x32xf32>
    %24 = vector.extract_strided_slice %15 {offsets = [0, 0, 64], sizes = [2, 2, 32], strides = [1, 1, 1]} : vector<2x2x96xf32> to vector<2x2x32xf32>
    %25 = math.tanh %23 : vector<2x2x32xf32>
    %26 = arith.mulf %24, %25 : vector<2x2x32xf32>
    %c0_13 = arith.constant 0 : index
    %c0_14 = arith.constant 0 : index
    %c0_15 = arith.constant 0 : index
    %27 = vector.load %arg5[%c0_13, %c0_14, %c0_15] : memref<2x2x32xf32, #tpu.memory_space<vmem>>, vector<2x2x32xf32>
    tpu.vector_store %arg5[%c0_13, %c0_14, %c0_15], %23 {strides = array<i32>} : memref<2x2x32xf32, #tpu.memory_space<vmem>>, vector<2x2x32xf32>,
    %c0_16 = arith.constant 0 : index
    %c0_17 = arith.constant 0 : index
    %c0_18 = arith.constant 0 : index
    %28 = vector.load %arg4[%c0_16, %c0_17, %c0_18] : memref<2x2x32xf32, #tpu.memory_space<vmem>>, vector<2x2x32xf32>
    tpu.vector_store %arg4[%c0_16, %c0_17, %c0_18], %26 {strides = array<i32>} : memref<2x2x32xf32, #tpu.memory_space<vmem>>, vector<2x2x32xf32>,
    %c0_19 = arith.constant 0 : index
    %29 = arith.index_cast %4 : i32 to index
    %c0_20 = arith.constant 0 : index
    %30 = vector.load %arg3[%c0_19, %29, %c0_20] : memref<2x16x32xf32, #tpu.memory_space<vmem>>, vector<2x2x32xf32>
    tpu.vector_store %arg3[%c0_19, %29, %c0_20], %26 {strides = array<i32>} : memref<2x16x32xf32, #tpu.memory_space<vmem>>, vector<2x2x32xf32>,
    %c1_i32 = arith.constant 1 : i32
    %c2_i32_21 = arith.constant 2 : i32
    %31 = arith.muli %c1_i32, %c2_i32_21 : i32
    %c0_22 = arith.constant 0 : index
    %32 = arith.index_cast %31 : i32 to index
    %c0_23 = arith.constant 0 : index
    %33 = vector.load %arg1[%c0_22, %32, %c0_23] : memref<2x16x128xf32, #tpu.memory_space<vmem>>, vector<2x2x128xf32>
    %c0_24 = arith.constant 0 : index
    %c0_25 = arith.constant 0 : index
    %c0_26 = arith.constant 0 : index
    %34 = vector.load %arg4[%c0_24, %c0_25, %c0_26] : memref<2x2x32xf32, #tpu.memory_space<vmem>>, vector<2x2x32xf32>
    "tpu.trace_start"() <{level = 10 : i32, message = "dbh,dhg->dbg"}> : () -> ()
    %cst_27 = arith.constant dense<0.000000e+00> : vector<2x2x128xf32>
    %35 = tpu.matmul %34, %3, %cst_27 {dimension_numbers = #tpu.dot_dimension_numbers<[2], [1], [1], [2], [0, 0, 0, 1, 1, 2], [0], [0]>} : vector<2x2x32xf32>, vector<2x32x128xf32>, vector<2x2x128xf32> -> vector<2x2x128xf32>
    "tpu.trace_stop"() : () -> ()
    %36 = arith.addf %33, %35 : vector<2x2x128xf32>
    %37 = vector.extract_strided_slice %36 {offsets = [0, 0, 0], sizes = [2, 2, 96], strides = [1, 1, 1]} : vector<2x2x128xf32> to vector<2x2x96xf32>
    %38 = arith.negf %37 : vector<2x2x96xf32>
    %39 = math.exp %38 : vector<2x2x96xf32>
    %cst_28 = arith.constant 1.000000e+00 : f32
    %40 = vector.broadcast %cst_28 : f32 to vector<2x2x96xf32>
    %41 = arith.addf %40, %39 : vector<2x2x96xf32>
    %42 = arith.divf %40, %41 : vector<2x2x96xf32>
    %43 = vector.extract_strided_slice %36 {offsets = [0, 0, 96], sizes = [2, 2, 32], strides = [1, 1, 1]} : vector<2x2x128xf32> to vector<2x2x32xf32>
    %44 = math.tanh %43 : vector<2x2x32xf32>
    %45 = vector.extract_strided_slice %42 {offsets = [0, 0, 32], sizes = [2, 2, 32], strides = [1, 1, 1]} : vector<2x2x96xf32> to vector<2x2x32xf32>
    %c0_29 = arith.constant 0 : index
    %c0_30 = arith.constant 0 : index
    %c0_31 = arith.constant 0 : index
    %46 = vector.load %arg5[%c0_29, %c0_30, %c0_31] : memref<2x2x32xf32, #tpu.memory_space<vmem>>, vector<2x2x32xf32>
    %47 = arith.mulf %45, %46 : vector<2x2x32xf32>
    %48 = vector.extract_strided_slice %42 {offsets = [0, 0, 0], sizes = [2, 2, 32], strides = [1, 1, 1]} : vector<2x2x96xf32> to vector<2x2x32xf32>
    %49 = arith.mulf %48, %44 : vector<2x2x32xf32>
    %50 = arith.addf %47, %49 : vector<2x2x32xf32>
    %51 = vector.extract_strided_slice %42 {offsets = [0, 0, 64], sizes = [2, 2, 32], strides = [1, 1, 1]} : vector<2x2x96xf32> to vector<2x2x32xf32>
    %52 = math.tanh %50 : vector<2x2x32xf32>
    %53 = arith.mulf %51, %52 : vector<2x2x32xf32>
    %c0_32 = arith.constant 0 : index
    %c0_33 = arith.constant 0 : index
    %c0_34 = arith.constant 0 : index
    %54 = vector.load %arg5[%c0_32, %c0_33, %c0_34] : memref<2x2x32xf32, #tpu.memory_space<vmem>>, vector<2x2x32xf32>
    tpu.vector_store %arg5[%c0_32, %c0_33, %c0_34], %50 {strides = array<i32>} : memref<2x2x32xf32, #tpu.memory_space<vmem>>, vector<2x2x32xf32>,
    %c0_35 = arith.constant 0 : index
    %c0_36 = arith.constant 0 : index
    %c0_37 = arith.constant 0 : index
    %55 = vector.load %arg4[%c0_35, %c0_36, %c0_37] : memref<2x2x32xf32, #tpu.memory_space<vmem>>, vector<2x2x32xf32>
    tpu.vector_store %arg4[%c0_35, %c0_36, %c0_37], %53 {strides = array<i32>} : memref<2x2x32xf32, #tpu.memory_space<vmem>>, vector<2x2x32xf32>,
    %c0_38 = arith.constant 0 : index
    %56 = arith.index_cast %31 : i32 to index
    %c0_39 = arith.constant 0 : index
    %57 = vector.load %arg3[%c0_38, %56, %c0_39] : memref<2x16x32xf32, #tpu.memory_space<vmem>>, vector<2x2x32xf32>
    tpu.vector_store %arg3[%c0_38, %56, %c0_39], %53 {strides = array<i32>} : memref<2x16x32xf32, #tpu.memory_space<vmem>>, vector<2x2x32xf32>,
    %c2_i32_40 = arith.constant 2 : i32
    %c2_i32_41 = arith.constant 2 : i32
    %58 = arith.muli %c2_i32_40, %c2_i32_41 : i32
    %c0_42 = arith.constant 0 : index
    %59 = arith.index_cast %58 : i32 to index
    %c0_43 = arith.constant 0 : index
    %60 = vector.load %arg1[%c0_42, %59, %c0_43] : memref<2x16x128xf32, #tpu.memory_space<vmem>>, vector<2x2x128xf32>
    %c0_44 = arith.constant 0 : index
    %c0_45 = arith.constant 0 : index
    %c0_46 = arith.constant 0 : index
    %61 = vector.load %arg4[%c0_44, %c0_45, %c0_46] : memref<2x2x32xf32, #tpu.memory_space<vmem>>, vector<2x2x32xf32>
    "tpu.trace_start"() <{level = 10 : i32, message = "dbh,dhg->dbg"}> : () -> ()
    %cst_47 = arith.constant dense<0.000000e+00> : vector<2x2x128xf32>
    %62 = tpu.matmul %61, %3, %cst_47 {dimension_numbers = #tpu.dot_dimension_numbers<[2], [1], [1], [2], [0, 0, 0, 1, 1, 2], [0], [0]>} : vector<2x2x32xf32>, vector<2x32x128xf32>, vector<2x2x128xf32> -> vector<2x2x128xf32>
    "tpu.trace_stop"() : () -> ()
    %63 = arith.addf %60, %62 : vector<2x2x128xf32>
    %64 = vector.extract_strided_slice %63 {offsets = [0, 0, 0], sizes = [2, 2, 96], strides = [1, 1, 1]} : vector<2x2x128xf32> to vector<2x2x96xf32>
    %65 = arith.negf %64 : vector<2x2x96xf32>
    %66 = math.exp %65 : vector<2x2x96xf32>
    %cst_48 = arith.constant 1.000000e+00 : f32
    %67 = vector.broadcast %cst_48 : f32 to vector<2x2x96xf32>
    %68 = arith.addf %67, %66 : vector<2x2x96xf32>
    %69 = arith.divf %67, %68 : vector<2x2x96xf32>
    %70 = vector.extract_strided_slice %63 {offsets = [0, 0, 96], sizes = [2, 2, 32], strides = [1, 1, 1]} : vector<2x2x128xf32> to vector<2x2x32xf32>
    %71 = math.tanh %70 : vector<2x2x32xf32>
    %72 = vector.extract_strided_slice %69 {offsets = [0, 0, 32], sizes = [2, 2, 32], strides = [1, 1, 1]} : vector<2x2x96xf32> to vector<2x2x32xf32>
    %c0_49 = arith.constant 0 : index
    %c0_50 = arith.constant 0 : index
    %c0_51 = arith.constant 0 : index
    %73 = vector.load %arg5[%c0_49, %c0_50, %c0_51] : memref<2x2x32xf32, #tpu.memory_space<vmem>>, vector<2x2x32xf32>
    %74 = arith.mulf %72, %73 : vector<2x2x32xf32>
    %75 = vector.extract_strided_slice %69 {offsets = [0, 0, 0], sizes = [2, 2, 32], strides = [1, 1, 1]} : vector<2x2x96xf32> to vector<2x2x32xf32>
    %76 = arith.mulf %75, %71 : vector<2x2x32xf32>
    %77 = arith.addf %74, %76 : vector<2x2x32xf32>
    %78 = vector.extract_strided_slice %69 {offsets = [0, 0, 64], sizes = [2, 2, 32], strides = [1, 1, 1]} : vector<2x2x96xf32> to vector<2x2x32xf32>
    %79 = math.tanh %77 : vector<2x2x32xf32>
    %80 = arith.mulf %78, %79 : vector<2x2x32xf32>
    %c0_52 = arith.constant 0 : index
    %c0_53 = arith.constant 0 : index
    %c0_54 = arith.constant 0 : index
    %81 = vector.load %arg5[%c0_52, %c0_53, %c0_54] : memref<2x2x32xf32, #tpu.memory_space<vmem>>, vector<2x2x32xf32>
    tpu.vector_store %arg5[%c0_52, %c0_53, %c0_54], %77 {strides = array<i32>} : memref<2x2x32xf32, #tpu.memory_space<vmem>>, vector<2x2x32xf32>,
    %c0_55 = arith.constant 0 : index
    %c0_56 = arith.constant 0 : index
    %c0_57 = arith.constant 0 : index
    %82 = vector.load %arg4[%c0_55, %c0_56, %c0_57] : memref<2x2x32xf32, #tpu.memory_space<vmem>>, vector<2x2x32xf32>
    tpu.vector_store %arg4[%c0_55, %c0_56, %c0_57], %80 {strides = array<i32>} : memref<2x2x32xf32, #tpu.memory_space<vmem>>, vector<2x2x32xf32>,
    %c0_58 = arith.constant 0 : index
    %83 = arith.index_cast %58 : i32 to index
    %c0_59 = arith.constant 0 : index
    %84 = vector.load %arg3[%c0_58, %83, %c0_59] : memref<2x16x32xf32, #tpu.memory_space<vmem>>, vector<2x2x32xf32>
    tpu.vector_store %arg3[%c0_58, %83, %c0_59], %80 {strides = array<i32>} : memref<2x16x32xf32, #tpu.memory_space<vmem>>, vector<2x2x32xf32>,
    %c3_i32 = arith.constant 3 : i32
    %c2_i32_60 = arith.constant 2 : i32
    %85 = arith.muli %c3_i32, %c2_i32_60 : i32
    %c0_61 = arith.constant 0 : index
    %86 = arith.index_cast %85 : i32 to index
    %c0_62 = arith.constant 0 : index
    %87 = vector.load %arg1[%c0_61, %86, %c0_62] : memref<2x16x128xf32, #tpu.memory_space<vmem>>, vector<2x2x128xf32>
    %c0_63 = arith.constant 0 : index
    %c0_64 = arith.constant 0 : index
    %c0_65 = arith.constant 0 : index
    %88 = vector.load %arg4[%c0_63, %c0_64, %c0_65] : memref<2x2x32xf32, #tpu.memory_space<vmem>>, vector<2x2x32xf32>
    "tpu.trace_start"() <{level = 10 : i32, message = "dbh,dhg->dbg"}> : () -> ()
    %cst_66 = arith.constant dense<0.000000e+00> : vector<2x2x128xf32>
    %89 = tpu.matmul %88, %3, %cst_66 {dimension_numbers = #tpu.dot_dimension_numbers<[2], [1], [1], [2], [0, 0, 0, 1, 1, 2], [0], [0]>} : vector<2x2x32xf32>, vector<2x32x128xf32>, vector<2x2x128xf32> -> vector<2x2x128xf32>
    "tpu.trace_stop"() : () -> ()
    %90 = arith.addf %87, %89 : vector<2x2x128xf32>
    %91 = vector.extract_strided_slice %90 {offsets = [0, 0, 0], sizes = [2, 2, 96], strides = [1, 1, 1]} : vector<2x2x128xf32> to vector<2x2x96xf32>
    %92 = arith.negf %91 : vector<2x2x96xf32>
    %93 = math.exp %92 : vector<2x2x96xf32>
    %cst_67 = arith.constant 1.000000e+00 : f32
    %94 = vector.broadcast %cst_67 : f32 to vector<2x2x96xf32>
    %95 = arith.addf %94, %93 : vector<2x2x96xf32>
    %96 = arith.divf %94, %95 : vector<2x2x96xf32>
    %97 = vector.extract_strided_slice %90 {offsets = [0, 0, 96], sizes = [2, 2, 32], strides = [1, 1, 1]} : vector<2x2x128xf32> to vector<2x2x32xf32>
    %98 = math.tanh %97 : vector<2x2x32xf32>
    %99 = vector.extract_strided_slice %96 {offsets = [0, 0, 32], sizes = [2, 2, 32], strides = [1, 1, 1]} : vector<2x2x96xf32> to vector<2x2x32xf32>
    %c0_68 = arith.constant 0 : index
    %c0_69 = arith.constant 0 : index
    %c0_70 = arith.constant 0 : index
    %100 = vector.load %arg5[%c0_68, %c0_69, %c0_70] : memref<2x2x32xf32, #tpu.memory_space<vmem>>, vector<2x2x32xf32>
    %101 = arith.mulf %99, %100 : vector<2x2x32xf32>
    %102 = vector.extract_strided_slice %96 {offsets = [0, 0, 0], sizes = [2, 2, 32], strides = [1, 1, 1]} : vector<2x2x96xf32> to vector<2x2x32xf32>
    %103 = arith.mulf %102, %98 : vector<2x2x32xf32>
    %104 = arith.addf %101, %103 : vector<2x2x32xf32>
    %105 = vector.extract_strided_slice %96 {offsets = [0, 0, 64], sizes = [2, 2, 32], strides = [1, 1, 1]} : vector<2x2x96xf32> to vector<2x2x32xf32>
    %106 = math.tanh %104 : vector<2x2x32xf32>
    %107 = arith.mulf %105, %106 : vector<2x2x32xf32>
    %c0_71 = arith.constant 0 : index
    %c0_72 = arith.constant 0 : index
    %c0_73 = arith.constant 0 : index
    %108 = vector.load %arg5[%c0_71, %c0_72, %c0_73] : memref<2x2x32xf32, #tpu.memory_space<vmem>>, vector<2x2x32xf32>
    tpu.vector_store %arg5[%c0_71, %c0_72, %c0_73], %104 {strides = array<i32>} : memref<2x2x32xf32, #tpu.memory_space<vmem>>, vector<2x2x32xf32>,
    %c0_74 = arith.constant 0 : index
    %c0_75 = arith.constant 0 : index
    %c0_76 = arith.constant 0 : index
    %109 = vector.load %arg4[%c0_74, %c0_75, %c0_76] : memref<2x2x32xf32, #tpu.memory_space<vmem>>, vector<2x2x32xf32>
    tpu.vector_store %arg4[%c0_74, %c0_75, %c0_76], %107 {strides = array<i32>} : memref<2x2x32xf32, #tpu.memory_space<vmem>>, vector<2x2x32xf32>,
    %c0_77 = arith.constant 0 : index
    %110 = arith.index_cast %85 : i32 to index
    %c0_78 = arith.constant 0 : index
    %111 = vector.load %arg3[%c0_77, %110, %c0_78] : memref<2x16x32xf32, #tpu.memory_space<vmem>>, vector<2x2x32xf32>
    tpu.vector_store %arg3[%c0_77, %110, %c0_78], %107 {strides = array<i32>} : memref<2x16x32xf32, #tpu.memory_space<vmem>>, vector<2x2x32xf32>,
    %c4_i32 = arith.constant 4 : i32
    %c2_i32_79 = arith.constant 2 : i32
    %112 = arith.muli %c4_i32, %c2_i32_79 : i32
    %c0_80 = arith.constant 0 : index
    %113 = arith.index_cast %112 : i32 to index
    %c0_81 = arith.constant 0 : index
    %114 = vector.load %arg1[%c0_80, %113, %c0_81] : memref<2x16x128xf32, #tpu.memory_space<vmem>>, vector<2x2x128xf32>
    %c0_82 = arith.constant 0 : index
    %c0_83 = arith.constant 0 : index
    %c0_84 = arith.constant 0 : index
    %115 = vector.load %arg4[%c0_82, %c0_83, %c0_84] : memref<2x2x32xf32, #tpu.memory_space<vmem>>, vector<2x2x32xf32>
    "tpu.trace_start"() <{level = 10 : i32, message = "dbh,dhg->dbg"}> : () -> ()
    %cst_85 = arith.constant dense<0.000000e+00> : vector<2x2x128xf32>
    %116 = tpu.matmul %115, %3, %cst_85 {dimension_numbers = #tpu.dot_dimension_numbers<[2], [1], [1], [2], [0, 0, 0, 1, 1, 2], [0], [0]>} : vector<2x2x32xf32>, vector<2x32x128xf32>, vector<2x2x128xf32> -> vector<2x2x128xf32>
    "tpu.trace_stop"() : () -> ()
    %117 = arith.addf %114, %116 : vector<2x2x128xf32>
    %118 = vector.extract_strided_slice %117 {offsets = [0, 0, 0], sizes = [2, 2, 96], strides = [1, 1, 1]} : vector<2x2x128xf32> to vector<2x2x96xf32>
    %119 = arith.negf %118 : vector<2x2x96xf32>
    %120 = math.exp %119 : vector<2x2x96xf32>
    %cst_86 = arith.constant 1.000000e+00 : f32
    %121 = vector.broadcast %cst_86 : f32 to vector<2x2x96xf32>
    %122 = arith.addf %121, %120 : vector<2x2x96xf32>
    %123 = arith.divf %121, %122 : vector<2x2x96xf32>
    %124 = vector.extract_strided_slice %117 {offsets = [0, 0, 96], sizes = [2, 2, 32], strides = [1, 1, 1]} : vector<2x2x128xf32> to vector<2x2x32xf32>
    %125 = math.tanh %124 : vector<2x2x32xf32>
    %126 = vector.extract_strided_slice %123 {offsets = [0, 0, 32], sizes = [2, 2, 32], strides = [1, 1, 1]} : vector<2x2x96xf32> to vector<2x2x32xf32>
    %c0_87 = arith.constant 0 : index
    %c0_88 = arith.constant 0 : index
    %c0_89 = arith.constant 0 : index
    %127 = vector.load %arg5[%c0_87, %c0_88, %c0_89] : memref<2x2x32xf32, #tpu.memory_space<vmem>>, vector<2x2x32xf32>
    %128 = arith.mulf %126, %127 : vector<2x2x32xf32>
    %129 = vector.extract_strided_slice %123 {offsets = [0, 0, 0], sizes = [2, 2, 32], strides = [1, 1, 1]} : vector<2x2x96xf32> to vector<2x2x32xf32>
    %130 = arith.mulf %129, %125 : vector<2x2x32xf32>
    %131 = arith.addf %128, %130 : vector<2x2x32xf32>
    %132 = vector.extract_strided_slice %123 {offsets = [0, 0, 64], sizes = [2, 2, 32], strides = [1, 1, 1]} : vector<2x2x96xf32> to vector<2x2x32xf32>
    %133 = math.tanh %131 : vector<2x2x32xf32>
    %134 = arith.mulf %132, %133 : vector<2x2x32xf32>
    %c0_90 = arith.constant 0 : index
    %c0_91 = arith.constant 0 : index
    %c0_92 = arith.constant 0 : index
    %135 = vector.load %arg5[%c0_90, %c0_91, %c0_92] : memref<2x2x32xf32, #tpu.memory_space<vmem>>, vector<2x2x32xf32>
    tpu.vector_store %arg5[%c0_90, %c0_91, %c0_92], %131 {strides = array<i32>} : memref<2x2x32xf32, #tpu.memory_space<vmem>>, vector<2x2x32xf32>,
    %c0_93 = arith.constant 0 : index
    %c0_94 = arith.constant 0 : index
    %c0_95 = arith.constant 0 : index
    %136 = vector.load %arg4[%c0_93, %c0_94, %c0_95] : memref<2x2x32xf32, #tpu.memory_space<vmem>>, vector<2x2x32xf32>
    tpu.vector_store %arg4[%c0_93, %c0_94, %c0_95], %134 {strides = array<i32>} : memref<2x2x32xf32, #tpu.memory_space<vmem>>, vector<2x2x32xf32>,
    %c0_96 = arith.constant 0 : index
    %137 = arith.index_cast %112 : i32 to index
    %c0_97 = arith.constant 0 : index
    %138 = vector.load %arg3[%c0_96, %137, %c0_97] : memref<2x16x32xf32, #tpu.memory_space<vmem>>, vector<2x2x32xf32>
    tpu.vector_store %arg3[%c0_96, %137, %c0_97], %134 {strides = array<i32>} : memref<2x16x32xf32, #tpu.memory_space<vmem>>, vector<2x2x32xf32>,
    %c5_i32 = arith.constant 5 : i32
    %c2_i32_98 = arith.constant 2 : i32
    %139 = arith.muli %c5_i32, %c2_i32_98 : i32
    %c0_99 = arith.constant 0 : index
    %140 = arith.index_cast %139 : i32 to index
    %c0_100 = arith.constant 0 : index
    %141 = vector.load %arg1[%c0_99, %140, %c0_100] : memref<2x16x128xf32, #tpu.memory_space<vmem>>, vector<2x2x128xf32>
    %c0_101 = arith.constant 0 : index
    %c0_102 = arith.constant 0 : index
    %c0_103 = arith.constant 0 : index
    %142 = vector.load %arg4[%c0_101, %c0_102, %c0_103] : memref<2x2x32xf32, #tpu.memory_space<vmem>>, vector<2x2x32xf32>
    "tpu.trace_start"() <{level = 10 : i32, message = "dbh,dhg->dbg"}> : () -> ()
    %cst_104 = arith.constant dense<0.000000e+00> : vector<2x2x128xf32>
    %143 = tpu.matmul %142, %3, %cst_104 {dimension_numbers = #tpu.dot_dimension_numbers<[2], [1], [1], [2], [0, 0, 0, 1, 1, 2], [0], [0]>} : vector<2x2x32xf32>, vector<2x32x128xf32>, vector<2x2x128xf32> -> vector<2x2x128xf32>
    "tpu.trace_stop"() : () -> ()
    %144 = arith.addf %141, %143 : vector<2x2x128xf32>
    %145 = vector.extract_strided_slice %144 {offsets = [0, 0, 0], sizes = [2, 2, 96], strides = [1, 1, 1]} : vector<2x2x128xf32> to vector<2x2x96xf32>
    %146 = arith.negf %145 : vector<2x2x96xf32>
    %147 = math.exp %146 : vector<2x2x96xf32>
    %cst_105 = arith.constant 1.000000e+00 : f32
    %148 = vector.broadcast %cst_105 : f32 to vector<2x2x96xf32>
    %149 = arith.addf %148, %147 : vector<2x2x96xf32>
    %150 = arith.divf %148, %149 : vector<2x2x96xf32>
    %151 = vector.extract_strided_slice %144 {offsets = [0, 0, 96], sizes = [2, 2, 32], strides = [1, 1, 1]} : vector<2x2x128xf32> to vector<2x2x32xf32>
    %152 = math.tanh %151 : vector<2x2x32xf32>
    %153 = vector.extract_strided_slice %150 {offsets = [0, 0, 32], sizes = [2, 2, 32], strides = [1, 1, 1]} : vector<2x2x96xf32> to vector<2x2x32xf32>
    %c0_106 = arith.constant 0 : index
    %c0_107 = arith.constant 0 : index
    %c0_108 = arith.constant 0 : index
    %154 = vector.load %arg5[%c0_106, %c0_107, %c0_108] : memref<2x2x32xf32, #tpu.memory_space<vmem>>, vector<2x2x32xf32>
    %155 = arith.mulf %153, %154 : vector<2x2x32xf32>
    %156 = vector.extract_strided_slice %150 {offsets = [0, 0, 0], sizes = [2, 2, 32], strides = [1, 1, 1]} : vector<2x2x96xf32> to vector<2x2x32xf32>
    %157 = arith.mulf %156, %152 : vector<2x2x32xf32>
    %158 = arith.addf %155, %157 : vector<2x2x32xf32>
    %159 = vector.extract_strided_slice %150 {offsets = [0, 0, 64], sizes = [2, 2, 32], strides = [1, 1, 1]} : vector<2x2x96xf32> to vector<2x2x32xf32>
    %160 = math.tanh %158 : vector<2x2x32xf32>
    %161 = arith.mulf %159, %160 : vector<2x2x32xf32>
    %c0_109 = arith.constant 0 : index
    %c0_110 = arith.constant 0 : index
    %c0_111 = arith.constant 0 : index
    %162 = vector.load %arg5[%c0_109, %c0_110, %c0_111] : memref<2x2x32xf32, #tpu.memory_space<vmem>>, vector<2x2x32xf32>
    tpu.vector_store %arg5[%c0_109, %c0_110, %c0_111], %158 {strides = array<i32>} : memref<2x2x32xf32, #tpu.memory_space<vmem>>, vector<2x2x32xf32>,
    %c0_112 = arith.constant 0 : index
    %c0_113 = arith.constant 0 : index
    %c0_114 = arith.constant 0 : index
    %163 = vector.load %arg4[%c0_112, %c0_113, %c0_114] : memref<2x2x32xf32, #tpu.memory_space<vmem>>, vector<2x2x32xf32>
    tpu.vector_store %arg4[%c0_112, %c0_113, %c0_114], %161 {strides = array<i32>} : memref<2x2x32xf32, #tpu.memory_space<vmem>>, vector<2x2x32xf32>,
    %c0_115 = arith.constant 0 : index
    %164 = arith.index_cast %139 : i32 to index
    %c0_116 = arith.constant 0 : index
    %165 = vector.load %arg3[%c0_115, %164, %c0_116] : memref<2x16x32xf32, #tpu.memory_space<vmem>>, vector<2x2x32xf32>
    tpu.vector_store %arg3[%c0_115, %164, %c0_116], %161 {strides = array<i32>} : memref<2x16x32xf32, #tpu.memory_space<vmem>>, vector<2x2x32xf32>,
    %c6_i32 = arith.constant 6 : i32
    %c2_i32_117 = arith.constant 2 : i32
    %166 = arith.muli %c6_i32, %c2_i32_117 : i32
    %c0_118 = arith.constant 0 : index
    %167 = arith.index_cast %166 : i32 to index
    %c0_119 = arith.constant 0 : index
    %168 = vector.load %arg1[%c0_118, %167, %c0_119] : memref<2x16x128xf32, #tpu.memory_space<vmem>>, vector<2x2x128xf32>
    %c0_120 = arith.constant 0 : index
    %c0_121 = arith.constant 0 : index
    %c0_122 = arith.constant 0 : index
    %169 = vector.load %arg4[%c0_120, %c0_121, %c0_122] : memref<2x2x32xf32, #tpu.memory_space<vmem>>, vector<2x2x32xf32>
    "tpu.trace_start"() <{level = 10 : i32, message = "dbh,dhg->dbg"}> : () -> ()
    %cst_123 = arith.constant dense<0.000000e+00> : vector<2x2x128xf32>
    %170 = tpu.matmul %169, %3, %cst_123 {dimension_numbers = #tpu.dot_dimension_numbers<[2], [1], [1], [2], [0, 0, 0, 1, 1, 2], [0], [0]>} : vector<2x2x32xf32>, vector<2x32x128xf32>, vector<2x2x128xf32> -> vector<2x2x128xf32>
    "tpu.trace_stop"() : () -> ()
    %171 = arith.addf %168, %170 : vector<2x2x128xf32>
    %172 = vector.extract_strided_slice %171 {offsets = [0, 0, 0], sizes = [2, 2, 96], strides = [1, 1, 1]} : vector<2x2x128xf32> to vector<2x2x96xf32>
    %173 = arith.negf %172 : vector<2x2x96xf32>
    %174 = math.exp %173 : vector<2x2x96xf32>
    %cst_124 = arith.constant 1.000000e+00 : f32
    %175 = vector.broadcast %cst_124 : f32 to vector<2x2x96xf32>
    %176 = arith.addf %175, %174 : vector<2x2x96xf32>
    %177 = arith.divf %175, %176 : vector<2x2x96xf32>
    %178 = vector.extract_strided_slice %171 {offsets = [0, 0, 96], sizes = [2, 2, 32], strides = [1, 1, 1]} : vector<2x2x128xf32> to vector<2x2x32xf32>
    %179 = math.tanh %178 : vector<2x2x32xf32>
    %180 = vector.extract_strided_slice %177 {offsets = [0, 0, 32], sizes = [2, 2, 32], strides = [1, 1, 1]} : vector<2x2x96xf32> to vector<2x2x32xf32>
    %c0_125 = arith.constant 0 : index
    %c0_126 = arith.constant 0 : index
    %c0_127 = arith.constant 0 : index
    %181 = vector.load %arg5[%c0_125, %c0_126, %c0_127] : memref<2x2x32xf32, #tpu.memory_space<vmem>>, vector<2x2x32xf32>
    %182 = arith.mulf %180, %181 : vector<2x2x32xf32>
    %183 = vector.extract_strided_slice %177 {offsets = [0, 0, 0], sizes = [2, 2, 32], strides = [1, 1, 1]} : vector<2x2x96xf32> to vector<2x2x32xf32>
    %184 = arith.mulf %183, %179 : vector<2x2x32xf32>
    %185 = arith.addf %182, %184 : vector<2x2x32xf32>
    %186 = vector.extract_strided_slice %177 {offsets = [0, 0, 64], sizes = [2, 2, 32], strides = [1, 1, 1]} : vector<2x2x96xf32> to vector<2x2x32xf32>
    %187 = math.tanh %185 : vector<2x2x32xf32>
    %188 = arith.mulf %186, %187 : vector<2x2x32xf32>
    %c0_128 = arith.constant 0 : index
    %c0_129 = arith.constant 0 : index
    %c0_130 = arith.constant 0 : index
    %189 = vector.load %arg5[%c0_128, %c0_129, %c0_130] : memref<2x2x32xf32, #tpu.memory_space<vmem>>, vector<2x2x32xf32>
    tpu.vector_store %arg5[%c0_128, %c0_129, %c0_130], %185 {strides = array<i32>} : memref<2x2x32xf32, #tpu.memory_space<vmem>>, vector<2x2x32xf32>,
    %c0_131 = arith.constant 0 : index
    %c0_132 = arith.constant 0 : index
    %c0_133 = arith.constant 0 : index
    %190 = vector.load %arg4[%c0_131, %c0_132, %c0_133] : memref<2x2x32xf32, #tpu.memory_space<vmem>>, vector<2x2x32xf32>
    tpu.vector_store %arg4[%c0_131, %c0_132, %c0_133], %188 {strides = array<i32>} : memref<2x2x32xf32, #tpu.memory_space<vmem>>, vector<2x2x32xf32>,
    %c0_134 = arith.constant 0 : index
    %191 = arith.index_cast %166 : i32 to index
    %c0_135 = arith.constant 0 : index
    %192 = vector.load %arg3[%c0_134, %191, %c0_135] : memref<2x16x32xf32, #tpu.memory_space<vmem>>, vector<2x2x32xf32>
    tpu.vector_store %arg3[%c0_134, %191, %c0_135], %188 {strides = array<i32>} : memref<2x16x32xf32, #tpu.memory_space<vmem>>, vector<2x2x32xf32>,
    %c7_i32 = arith.constant 7 : i32
    %c2_i32_136 = arith.constant 2 : i32
    %193 = arith.muli %c7_i32, %c2_i32_136 : i32
    %c0_137 = arith.constant 0 : index
    %194 = arith.index_cast %193 : i32 to index
    %c0_138 = arith.constant 0 : index
    %195 = vector.load %arg1[%c0_137, %194, %c0_138] : memref<2x16x128xf32, #tpu.memory_space<vmem>>, vector<2x2x128xf32>
    %c0_139 = arith.constant 0 : index
    %c0_140 = arith.constant 0 : index
    %c0_141 = arith.constant 0 : index
    %196 = vector.load %arg4[%c0_139, %c0_140, %c0_141] : memref<2x2x32xf32, #tpu.memory_space<vmem>>, vector<2x2x32xf32>
    "tpu.trace_start"() <{level = 10 : i32, message = "dbh,dhg->dbg"}> : () -> ()
    %cst_142 = arith.constant dense<0.000000e+00> : vector<2x2x128xf32>
    %197 = tpu.matmul %196, %3, %cst_142 {dimension_numbers = #tpu.dot_dimension_numbers<[2], [1], [1], [2], [0, 0, 0, 1, 1, 2], [0], [0]>} : vector<2x2x32xf32>, vector<2x32x128xf32>, vector<2x2x128xf32> -> vector<2x2x128xf32>
    "tpu.trace_stop"() : () -> ()
    %198 = arith.addf %195, %197 : vector<2x2x128xf32>
    %199 = vector.extract_strided_slice %198 {offsets = [0, 0, 0], sizes = [2, 2, 96], strides = [1, 1, 1]} : vector<2x2x128xf32> to vector<2x2x96xf32>
    %200 = arith.negf %199 : vector<2x2x96xf32>
    %201 = math.exp %200 : vector<2x2x96xf32>
    %cst_143 = arith.constant 1.000000e+00 : f32
    %202 = vector.broadcast %cst_143 : f32 to vector<2x2x96xf32>
    %203 = arith.addf %202, %201 : vector<2x2x96xf32>
    %204 = arith.divf %202, %203 : vector<2x2x96xf32>
    %205 = vector.extract_strided_slice %198 {offsets = [0, 0, 96], sizes = [2, 2, 32], strides = [1, 1, 1]} : vector<2x2x128xf32> to vector<2x2x32xf32>
    %206 = math.tanh %205 : vector<2x2x32xf32>
    %207 = vector.extract_strided_slice %204 {offsets = [0, 0, 32], sizes = [2, 2, 32], strides = [1, 1, 1]} : vector<2x2x96xf32> to vector<2x2x32xf32>
    %c0_144 = arith.constant 0 : index
    %c0_145 = arith.constant 0 : index
    %c0_146 = arith.constant 0 : index
    %208 = vector.load %arg5[%c0_144, %c0_145, %c0_146] : memref<2x2x32xf32, #tpu.memory_space<vmem>>, vector<2x2x32xf32>
    %209 = arith.mulf %207, %208 : vector<2x2x32xf32>
    %210 = vector.extract_strided_slice %204 {offsets = [0, 0, 0], sizes = [2, 2, 32], strides = [1, 1, 1]} : vector<2x2x96xf32> to vector<2x2x32xf32>
    %211 = arith.mulf %210, %206 : vector<2x2x32xf32>
    %212 = arith.addf %209, %211 : vector<2x2x32xf32>
    %213 = vector.extract_strided_slice %204 {offsets = [0, 0, 64], sizes = [2, 2, 32], strides = [1, 1, 1]} : vector<2x2x96xf32> to vector<2x2x32xf32>
    %214 = math.tanh %212 : vector<2x2x32xf32>
    %215 = arith.mulf %213, %214 : vector<2x2x32xf32>
    %c0_147 = arith.constant 0 : index
    %c0_148 = arith.constant 0 : index
    %c0_149 = arith.constant 0 : index
    %216 = vector.load %arg5[%c0_147, %c0_148, %c0_149] : memref<2x2x32xf32, #tpu.memory_space<vmem>>, vector<2x2x32xf32>
    tpu.vector_store %arg5[%c0_147, %c0_148, %c0_149], %212 {strides = array<i32>} : memref<2x2x32xf32, #tpu.memory_space<vmem>>, vector<2x2x32xf32>,
    %c0_150 = arith.constant 0 : index
    %c0_151 = arith.constant 0 : index
    %c0_152 = arith.constant 0 : index
    %217 = vector.load %arg4[%c0_150, %c0_151, %c0_152] : memref<2x2x32xf32, #tpu.memory_space<vmem>>, vector<2x2x32xf32>
    tpu.vector_store %arg4[%c0_150, %c0_151, %c0_152], %215 {strides = array<i32>} : memref<2x2x32xf32, #tpu.memory_space<vmem>>, vector<2x2x32xf32>,
    %c0_153 = arith.constant 0 : index
    %218 = arith.index_cast %193 : i32 to index
    %c0_154 = arith.constant 0 : index
    %219 = vector.load %arg3[%c0_153, %218, %c0_154] : memref<2x16x32xf32, #tpu.memory_space<vmem>>, vector<2x2x32xf32>
    tpu.vector_store %arg3[%c0_153, %218, %c0_154], %215 {strides = array<i32>} : memref<2x16x32xf32, #tpu.memory_space<vmem>>, vector<2x2x32xf32>,
    %c8_i32 = arith.constant 8 : i32
    return
  }
  func.func @transform_0(%arg0: i32) -> (i32, i32, i32) {
    %c0_i32 = arith.constant 0 : i32
    %c0_i32_0 = arith.constant 0 : i32
    %c0_i32_1 = arith.constant 0 : i32
    return %c0_i32, %arg0, %c0_i32_0 : i32, i32, i32
  }
  func.func @transform_1(%arg0: i32) -> (i32, i32, i32) {
    %c0_i32 = arith.constant 0 : i32
    %c0_i32_0 = arith.constant 0 : i32
    %c0_i32_1 = arith.constant 0 : i32
    %c0_i32_2 = arith.constant 0 : i32
    return %c0_i32, %c0_i32_0, %c0_i32_1 : i32, i32, i32
  }
  func.func @transform_2(%arg0: i32) -> (i32, i32, i32) {
    %c0_i32 = arith.constant 0 : i32
    %c0_i32_0 = arith.constant 0 : i32
    %c0_i32_1 = arith.constant 0 : i32
    return %c0_i32, %arg0, %c0_i32_0 : i32, i32, i32
  }
}

</mosaic_0001>

<bundles_post_ra>
// kernel: tpu_custom_call.1
= control target key start
LH: loop header
LB: loop body
LE: loop exit
PB: predicated region body
PF: predicated region fallthrough
CT: control target
= control target key end

     0   :  { %7 = vsyncpa [#allocation5], 0  ;;  %s2871_s0 = inlined_call_operand.hbm [shape: f32[2,16,128], index: 0, kind: input, shape index: {}]   ;;  %s2872_s1 = inlined_call_operand.hbm [shape: f32[2,32,128], index: 1, kind: input, shape index: {}]   ;;  %s2873_s2 = inlined_call_operand.hbm [shape: f32[2,16,32], index: 2, kind: output, shape index: {}]  }
   0x1   :  { %8 = vsyncpa [#allocation8], 0 }
   0x2   :  { %9 = vsyncpa [#allocation6], 0  ;;  %s2528_s9 = smov [#allocation4]   ;;  %s2456_s13 = scalar_lea.hbm %s2871_s0, 512 }
   0x3   :  { %s15_s10 = sshll.u32 %s2528_s9, 4  ;;  %p2457_p0 = scmp.ne.s32.totalorder %s2871_s0, %s2456_s13  ;;  %s16_s10 = int_to_ptr.vmem [resolvable:$true] %s15_s10 }
   0x4   :  { %p2460_p1 = scmp.lt.u32.totalorder %s2456_s13, %s2871_s0 }
   0x6   :  { %p2462_p2 = pnand %p2460_p1, %p2457_p0 }
   0x8   :  { %2465 = shalt.err (!%p2462_p2)
}
   0x9   :  { %s2466_s18 = scalar_lea.vmem %s16_s10, 512  ;;  %p2471_p4 = scmp.lt.s32.totalorder %s16_s10, %s16_s10 }
   0xa   :  { %p2467_p3 = scmp.ne.s32.totalorder %s16_s10, %s2466_s18  ;;  %p2472_p5 = scmp.lt.s32.totalorder %s2466_s18, %s2466_s18 }
   0xc   :  { %p2473_p6 = por %p2472_p5, %p2471_p4 }
   0xe   :  { %p2474_p7 = pnand %p2473_p6, %p2467_p3 }
  0x10   :  { %2477 = shalt.err (!%p2474_p7)
}
  0x11   :  { %s2529_s19 = smov 128   ;;  %s2530_s20 = smov 8  }
  0x12   :  { %21 = dma.hbm_to_vmem [thread:$0]  %s2871_s0, 512, %s16_s10, [#allocation5], %s2529_s19, %s2529_s19, %s2530_s20  }
  0x13   :  { %s2531_s23 = smov [#allocation7]   ;;  %s2478_s27 = scalar_lea.hbm %s2872_s1, 1024 }
  0x14   :  { %s27_s24 = sshll.u32 %s2531_s23, 4  ;;  %p2479_p8 = scmp.ne.s32.totalorder %s2872_s1, %s2478_s27  ;;  %s28_s24 = int_to_ptr.vmem [resolvable:$true] %s27_s24 }
  0x15   :  { %p2482_p9 = scmp.lt.u32.totalorder %s2478_s27, %s2872_s1 }
  0x17   :  { %p2484_p10 = pnand %p2482_p9, %p2479_p8 }
  0x19   :  { %2487 = shalt.err (!%p2484_p10)
}
  0x1a   :  { %s2488_s4 = scalar_lea.vmem %s28_s24, 1024  ;;  %p2493_p12 = scmp.lt.s32.totalorder %s28_s24, %s28_s24 }
  0x1b   :  { %p2489_p11 = scmp.ne.s32.totalorder %s28_s24, %s2488_s4  ;;  %p2494_p13 = scmp.lt.s32.totalorder %s2488_s4, %s2488_s4 }
  0x1d   :  { %p2495_p0 = por %p2494_p13, %p2493_p12 }
  0x1f   :  { %p2496_p1 = pnand %p2495_p0, %p2489_p11 }
  0x21   :  { %2499 = shalt.err (!%p2496_p1)
}
  0x22   :  { %33 = dma.hbm_to_vmem [thread:$0]  %s2872_s1, 1024, %s28_s24, [#allocation8], %s2529_s19, %s2529_s19, %s2530_s20  }
  0x23   :  { %2522 = dma.done.wait [#allocation5], 512  }
  0x24   :  { %2523 = vsyncadd [#allocation5], 4294966784 }
  0x25   :  { %2524 = dma.done.wait [#allocation8], 1024  }
  0x26   :  { %2525 = vsyncadd [#allocation8], 4294966272  ;;  %vm44_vm0 = vcmask 254976   ;;  %v2532_v0 = vmov 0.0|0.0   ;;  %v2533_v1 = vmov 0.0   ;;  %vm2534_vm1 = vmmov 0  }
  0x27   :  { %2221 = vmatprep.subr.bf16.mxu0 %v2532_v0  ;;  %2227 = vmatprep.subr.bf16.mxu1 %v2532_v0  ;;  %45 = vst.msk [vmem:[#allocation2] sm:$0x3] %vm44_vm0, %v2533_v1  ;;  %46 = vst.msk [vmem:[#allocation2 + $0x2] sm:$0x3] %vm44_vm0, %v2533_v1  ;;  %v49_v2 = vld [vmem:[#allocation7] sm:$0xff]  ;;  %v50_v3 = vld [vmem:[#allocation7 + $0x8] sm:$0xff] }
  0x28   :  { %47 = vst.msk [vmem:[#allocation3] sm:$0x3] %vm44_vm0, %v2533_v1  ;;  %48 = vst.msk [vmem:[#allocation3 + $0x2] sm:$0x3] %vm44_vm0, %v2533_v1  ;;  %2053 = vmatprep.mubr.msk.f32.mxu0 %vm2534_vm1, %v2533_v1  ;;  %2064 = vmatprep.mubr.msk.f32.mxu1 %vm2534_vm1, %v2533_v1  ;;  %v53_v4 = vld [vmem:[#allocation7 + $0x20] sm:$0xff]  ;;  %v2598_v5 = vpack.c.bf16 %v50_v3, %v49_v2  ;;  %v54_v6 = vld [vmem:[#allocation7 + $0x28] sm:$0xff] }
  0x29   :  { %v51_v7 = vld [vmem:[#allocation7 + $0x10] sm:$0xff]  ;;  %v52_v8 = vld [vmem:[#allocation7 + $0x18] sm:$0xff]  ;;  %v2600_v9 = vpack.c.bf16 %v54_v6, %v53_v4  ;;  %s2535_s1 = smov 32   ;;  %vm61_vm2 = vcmask 261120   ;;  %v57_v18 = vld [vmem:[#allocation4] sm:$0x3] }
  0x2a   :  { %v55_v10 = vld [vmem:[#allocation7 + $0x30] sm:$0xff]  ;;  %v56_v11 = vld [vmem:[#allocation7 + $0x38] sm:$0xff]  ;;  %2223 = vmatpush3.bf16.msra.mxu0 %v2598_v5  ;;  %v2603_v12 = vpack.c.bf16 %v52_v8, %v51_v7  ;;  %s2536_s6 = smov 64   ;;  %s2537_s7 = smov 96   ;;  %v291_v60 = vld [vmem:[#allocation4 + $0x2] sm:$0x3] }
  0x2b   :  { %2224 = vmatprep.subr.bf16.mxu0 %v2532_v0  ;;  %2229 = vmatpush3.bf16.msra.mxu1 %v2600_v9  ;;  %v2607_v14 = vpack.c.bf16 %v56_v11, %v55_v10  ;;  %v58_v19 = vld [vmem:[#allocation4 + $0x10] sm:$0x3]  ;;  %v292_v2 = vld [vmem:[#allocation4 + $0x12] sm:$0x3]  ;;  %s2538_s8 = smov [#allocation9]  }
  0x2c   :  { %2230 = vmatprep.subr.bf16.mxu1 %v2532_v0  ;;  %s1920_s9 = sshll.u32 %s2538_s8, 4  ;;  %s1921_s9 = int_to_ptr.vmem [resolvable:$true] %s1920_s9 }
  0x2d   :  { %s2500_s10 = scalar_lea.vmem %s1921_s9, 512  ;;  %p2505_p3 = scmp.lt.s32.totalorder %s1921_s9, %s1921_s9 }
  0x2e   :  { %2226 = vmatpush3.bf16.msra.mxu0 %v2603_v12  ;;  %v59_v16 = vld [vmem:[#allocation2] sm:$0x3]  ;;  %v60_v17 = vld [vmem:[#allocation2 + $0x2] sm:$0x3]  ;;  %p2501_p2 = scmp.ne.s32.totalorder %s1921_s9, %s2500_s10  ;;  %p2506_p4 = scmp.lt.s32.totalorder %s2500_s10, %s2500_s10 }
  0x2f   :  { %v224_v13 = vld [vmem:[#allocation3] sm:$0x3]  ;;  %v225_v15 = vld [vmem:[#allocation3 + $0x2] sm:$0x3]  ;;  %2232 = vmatpush3.bf16.msra.mxu1 %v2607_v14  ;;  %2233 = vmatprep.subr.bf16.mxu0 %v2532_v0 }
  0x30   :  { %228 = vrot.lane.b32.xlu1 %v224_v13, %s2535_s1  ;;  %2239 = vmatprep.subr.bf16.mxu1 %v2532_v0  ;;  %p2507_p5 = por %p2506_p4, %p2505_p3 }
  0x31   :  { %2054 = vmatmul.mubr.msk.f32.vlgmr.msra.gmra.mrb[0].mxu0 %vm61_vm2, %v59_v16 }
  0x32   :  { %2065 = vmatmul.mubr.msk.f32.vlgmr.msra.gmra.mrb[0].mxu1 %vm61_vm2, %v60_v17  ;;  %2235 = vmatpush3.bf16.msra.mxu0 %v2598_v5  ;;  %p2508_p6 = pnand %p2507_p5, %p2501_p2 }
  0x33   :  { %2236 = vmatprep.subr.bf16.mxu0 %v2532_v0  ;;  %2241 = vmatpush3.bf16.msra.mxu1 %v2600_v9 }
  0x34   :  { %230 = vrot.lane.b32.xlu1 %v225_v15, %s2535_s1  ;;  %2075 = vmatprep.mubr.msk.f32.mxu0 %vm2534_vm1, %v2533_v1 }
  0x35   :  { %2242 = vmatprep.subr.bf16.mxu1 %v2532_v0  ;;  %2086 = vmatprep.mubr.msk.f32.mxu1 %vm2534_vm1, %v2533_v1 }
  0x36   :  { %2238 = vmatpush3.bf16.msra.mxu0 %v2603_v12 }
  0x37   :  { %2244 = vmatpush3.bf16.msra.mxu1 %v2607_v14  ;;  %2245 = vmatprep.subr.bf16.mxu0 %v2532_v0 }
  0x38   :  { %2251 = vmatprep.subr.bf16.mxu1 %v2532_v0 }
  0xa2   :  { %v229_v40 = vpop.permute.xlu1 %228 }
  0xa6   :  { %v231_v42 = vpop.permute.xlu1 %230 }
 0x104   :  { %v131_v20 = vpop.f32.mrb[0].mxu0 }
 0x105   :  { %v208_v21 = vadd.f32 %v131_v20, %v57_v18  ;;  %v2055_v22 = vpop.f32.mrb[1].mxu0  ;;  %v204_v23 = vpop.f32.mrb[0].mxu1 }
 0x106   :  { %v209_v24 = vadd.f32 %v204_v23, %v58_v19  ;;  %v2066_v25 = vpop.f32.mrb[1].mxu1 }
 0x107   :  { %2328 = vtanh.f32 %v208_v21  ;;  %v1935_v28 = vmul.f32 -1.442695, %v208_v21 }
 0x108   :  { %2330 = vtanh.f32 %v209_v24  ;;  %v1936_v29 = vmul.f32 -1.442695, %v209_v24 }
 0x109   :  { %2332 = vpow2.f32 %v1935_v28 }
 0x10a   :  { %2334 = vpow2.f32 %v1936_v29 }
 0x111   :  { %v2329_v26 = vpop.eup %2328 }
 0x112   :  { %238 = vrot.lane.b32.xlu0 %v2329_v26, %s2535_s1  ;;  %v2331_v27 = vpop.eup %2330 }
 0x113   :  { %v2333_v30 = vpop.eup %2332 }
 0x114   :  { %v216_v31 = vadd.f32 1.0, %v2333_v30  ;;  %v2335_v32 = vpop.eup %2334 }
 0x115   :  { %v217_v33 = vadd.f32 1.0, %v2335_v32 }
 0x116   :  { %240 = vrot.lane.b32.xlu0 %v2331_v27, %s2535_s1  ;;  %2336 = vrcp.f32 %v216_v31 }
 0x117   :  { %2338 = vrcp.f32 %v217_v33 }
 0x120   :  { %v2337_v34 = vpop.eup %2336 }
 0x121   :  { %v2339_v37 = vpop.eup %2338  ;;  %v234_v41 = vmul.f32 %v2337_v34, %v229_v40 }
 0x122   :  { %v235_v45 = vmul.f32 %v2339_v37, %v231_v42 }
 0x184   :  { %v239_v35 = vpop.permute.xlu0 %238 }
 0x185   :  { %v244_v36 = vmul.f32 %v2337_v34, %v239_v35 }
 0x187   :  { %248 = vrot.lane.b32.xlu0 %v244_v36, %s2535_s1 }
 0x188   :  { %v241_v38 = vpop.permute.xlu0 %240 }
 0x189   :  { %v245_v39 = vmul.f32 %v2339_v37, %v241_v38 }
 0x18b   :  { %250 = vrot.lane.b32.xlu1 %v245_v39, %s2535_s1 }
 0x1f9   :  { %v249_v43 = vpop.permute.xlu0 %248 }
 0x1fa   :  { %v254_v44 = vadd.f32 %v249_v43, %v234_v41 }
 0x1fc   :  { %2340 = vtanh.f32 %v254_v44 }
 0x1fd   :  { %v251_v46 = vpop.permute.xlu1 %250 }
 0x1fe   :  { %v255_v47 = vadd.f32 %v251_v46, %v235_v45  ;;  %v523_v46 = vld [vmem:[#allocation4 + $0x4] sm:$0x3] }
 0x200   :  { %2342 = vtanh.f32 %v255_v47 }
 0x206   :  { %v2341_v48 = vpop.eup %2340 }
 0x207   :  { %260 = vrot.lane.b32.xlu0 %v2341_v48, %s2535_s1 }
 0x20a   :  { %v2343_v49 = vpop.eup %2342 }
 0x20b   :  { %262 = vrot.lane.b32.xlu1 %v2343_v49, %s2535_s1 }
 0x279   :  { %v261_v50 = vpop.permute.xlu0 %260 }
 0x27a   :  { %v266_v51 = vmul.f32 %v2337_v34, %v261_v50  ;;  %v524_v50 = vld [vmem:[#allocation4 + $0x14] sm:$0x3] }
 0x27c   :  { %281 = vrot.lane.b32.xlu0 %v266_v51, %s2536_s6 }
 0x27d   :  { %v263_v52 = vpop.permute.xlu1 %262 }
 0x27e   :  { %v267_v53 = vmul.f32 %v2339_v37, %v263_v52 }
 0x280   :  { %283 = vrot.lane.b32.xlu1 %v267_v53, %s2536_s6  ;;  %270 = vrot.lane.b32.xlu0 %v254_v44, %s2537_s7 }
 0x284   :  { %272 = vrot.lane.b32.xlu1 %v255_v47, %s2537_s7 }
 0x2ee   :  { %v282_v54 = vpop.permute.xlu0 %281 }
 0x2ef   :  { %287 = vst.msk [vmem:[#allocation2] sm:$0x3] %vm44_vm0, %v282_v54  ;;  %289 = vst.msk [vmem:[#allocation9] sm:$0x3] %vm44_vm0, %v282_v54 }
 0x2f2   :  { %v284_v55 = vpop.permute.xlu1 %283  ;;  %v271_v56 = vpop.permute.xlu0 %270 }
 0x2f3   :  { %288 = vst.msk [vmem:[#allocation2 + $0x2] sm:$0x3] %vm44_vm0, %v284_v55  ;;  %290 = vst.msk [vmem:[#allocation9 + $0x10] sm:$0x3] %vm44_vm0, %v284_v55 }
 0x2f4   :  { %277 = vst.msk [vmem:[#allocation3] sm:$0x3] %vm44_vm0, %v271_v56 }
 0x2f6   :  { %v273_v57 = vpop.permute.xlu1 %272  ;;  %v293_v58 = vld [vmem:[#allocation2] sm:$0x3] }
 0x2f7   :  { %278 = vst.msk [vmem:[#allocation3 + $0x2] sm:$0x3] %vm44_vm0, %v273_v57  ;;  %2076 = vmatmul.mubr.msk.f32.vlgmr.msra.gmra.mrb[2].mxu0 %vm61_vm2, %v293_v58 }
 0x2f8   :  { %2247 = vmatpush3.bf16.msra.mxu0 %v2598_v5  ;;  %2097 = vmatprep.mubr.msk.f32.mxu0 %vm2534_vm1, %v2533_v1 }
 0x2f9   :  { %2248 = vmatprep.subr.bf16.mxu0 %v2532_v0 }
 0x2fa   :  { %v294_v59 = vld [vmem:[#allocation2 + $0x2] sm:$0x3] }
 0x2fb   :  { %2087 = vmatmul.mubr.msk.f32.vlgmr.msra.gmra.mrb[2].mxu1 %vm61_vm2, %v294_v59  ;;  %v457_v10 = vld [vmem:[#allocation3] sm:$0x3] }
 0x2fc   :  { %2250 = vmatpush3.bf16.msra.mxu0 %v2603_v12  ;;  %2253 = vmatpush3.bf16.msra.mxu1 %v2600_v9 }
 0x2fd   :  { %2254 = vmatprep.subr.bf16.mxu1 %v2532_v0  ;;  %2108 = vmatprep.mubr.msk.f32.mxu1 %vm2534_vm1, %v2533_v1 }
 0x2fe   :  { %2257 = vmatprep.subr.bf16.mxu0 %v2532_v0  ;;  %v458_v11 = vld [vmem:[#allocation3 + $0x2] sm:$0x3] }
 0x300   :  { %2256 = vmatpush3.bf16.msra.mxu1 %v2607_v14 }
 0x301   :  { %2263 = vmatprep.subr.bf16.mxu1 %v2532_v0 }
 0x3ca   :  { %v364_v61 = vpop.f32.mrb[2].mxu0 }
 0x3cb   :  { %v441_v62 = vadd.f32 %v364_v61, %v291_v60  ;;  %v2077_v63 = vpop.f32.mrb[3].mxu0 }
 0x3cd   :  { %2344 = vtanh.f32 %v441_v62  ;;  %v1939_v13 = vmul.f32 -1.442695, %v441_v62 }
 0x3ce   :  { %v437_v3 = vpop.f32.mrb[2].mxu1 }
 0x3cf   :  { %v442_v4 = vadd.f32 %v437_v3, %v292_v2  ;;  %v2088_v6 = vpop.f32.mrb[3].mxu1 }
 0x3d1   :  { %2346 = vtanh.f32 %v442_v4  ;;  %v1940_v15 = vmul.f32 -1.442695, %v442_v4 }
 0x3d2   :  { %2348 = vpow2.f32 %v1939_v13 }
 0x3d3   :  { %2350 = vpow2.f32 %v1940_v15 }
 0x3d7   :  { %v2345_v7 = vpop.eup %2344 }
 0x3d8   :  { %471 = vrot.lane.b32.xlu0 %v2345_v7, %s2535_s1 }
 0x3db   :  { %v2347_v8 = vpop.eup %2346 }
 0x3dc   :  { %473 = vrot.lane.b32.xlu1 %v2347_v8, %s2535_s1  ;;  %461 = vrot.lane.b32.xlu0 %v457_v10, %s2535_s1  ;;  %v2349_v16 = vpop.eup %2348 }
 0x3dd   :  { %v449_v17 = vadd.f32 1.0, %v2349_v16  ;;  %v2351_v18 = vpop.eup %2350 }
 0x3de   :  { %v450_v19 = vadd.f32 1.0, %v2351_v18 }
 0x3df   :  { %2352 = vrcp.f32 %v449_v17 }
 0x3e0   :  { %463 = vrot.lane.b32.xlu1 %v458_v11, %s2535_s1  ;;  %2354 = vrcp.f32 %v450_v19 }
 0x3e9   :  { %v2353_v20 = vpop.eup %2352 }
 0x3ea   :  { %v2355_v23 = vpop.eup %2354 }
 0x44a   :  { %v472_v21 = vpop.permute.xlu0 %471 }
 0x44b   :  { %v477_v22 = vmul.f32 %v2353_v20, %v472_v21 }
 0x44d   :  { %481 = vrot.lane.b32.xlu0 %v477_v22, %s2535_s1 }
 0x44e   :  { %v474_v24 = vpop.permute.xlu1 %473  ;;  %v462_v26 = vpop.permute.xlu0 %461 }
 0x44f   :  { %v478_v25 = vmul.f32 %v2355_v23, %v474_v24  ;;  %v467_v27 = vmul.f32 %v2353_v20, %v462_v26 }
 0x451   :  { %483 = vrot.lane.b32.xlu1 %v478_v25, %s2535_s1 }
 0x452   :  { %v464_v28 = vpop.permute.xlu1 %463 }
 0x453   :  { %v468_v31 = vmul.f32 %v2355_v23, %v464_v28 }
 0x4bf   :  { %v482_v29 = vpop.permute.xlu0 %481 }
 0x4c0   :  { %v487_v30 = vadd.f32 %v482_v29, %v467_v27 }
 0x4c2   :  { %2356 = vtanh.f32 %v487_v30 }
 0x4c3   :  { %v484_v32 = vpop.permute.xlu1 %483 }
 0x4c4   :  { %v488_v33 = vadd.f32 %v484_v32, %v468_v31  ;;  %v755_v32 = vld [vmem:[#allocation4 + $0x6] sm:$0x3] }
 0x4c6   :  { %2358 = vtanh.f32 %v488_v33 }
 0x4cc   :  { %v2357_v34 = vpop.eup %2356 }
 0x4cd   :  { %493 = vrot.lane.b32.xlu0 %v2357_v34, %s2535_s1 }
 0x4d0   :  { %v2359_v35 = vpop.eup %2358 }
 0x4d1   :  { %495 = vrot.lane.b32.xlu1 %v2359_v35, %s2535_s1 }
 0x53f   :  { %v494_v36 = vpop.permute.xlu0 %493 }
 0x540   :  { %v499_v37 = vmul.f32 %v2353_v20, %v494_v36  ;;  %v756_v36 = vld [vmem:[#allocation4 + $0x16] sm:$0x3] }
 0x542   :  { %513 = vrot.lane.b32.xlu0 %v499_v37, %s2536_s6 }
 0x543   :  { %v496_v38 = vpop.permute.xlu1 %495 }
 0x544   :  { %v500_v39 = vmul.f32 %v2355_v23, %v496_v38 }
 0x546   :  { %515 = vrot.lane.b32.xlu1 %v500_v39, %s2536_s6  ;;  %503 = vrot.lane.b32.xlu0 %v487_v30, %s2537_s7 }
 0x54a   :  { %505 = vrot.lane.b32.xlu1 %v488_v33, %s2537_s7 }
 0x5b4   :  { %v514_v40 = vpop.permute.xlu0 %513 }
 0x5b5   :  { %519 = vst.msk [vmem:[#allocation2] sm:$0x3] %vm44_vm0, %v514_v40  ;;  %521 = vst.msk [vmem:[#allocation9 + $0x2] sm:$0x3] %vm44_vm0, %v514_v40 }
 0x5b8   :  { %v516_v41 = vpop.permute.xlu1 %515  ;;  %v504_v42 = vpop.permute.xlu0 %503 }
 0x5b9   :  { %520 = vst.msk [vmem:[#allocation2 + $0x2] sm:$0x3] %vm44_vm0, %v516_v41  ;;  %522 = vst.msk [vmem:[#allocation9 + $0x12] sm:$0x3] %vm44_vm0, %v516_v41 }
 0x5ba   :  { %509 = vst.msk [vmem:[#allocation3] sm:$0x3] %vm44_vm0, %v504_v42 }
 0x5bc   :  { %v506_v43 = vpop.permute.xlu1 %505  ;;  %v525_v44 = vld [vmem:[#allocation2] sm:$0x3] }
 0x5bd   :  { %510 = vst.msk [vmem:[#allocation3 + $0x2] sm:$0x3] %vm44_vm0, %v506_v43  ;;  %2098 = vmatmul.mubr.msk.f32.vlgmr.msra.gmra.mrb[4].mxu0 %vm61_vm2, %v525_v44 }
 0x5be   :  { %2259 = vmatpush3.bf16.msra.mxu0 %v2598_v5  ;;  %2119 = vmatprep.mubr.msk.f32.mxu0 %vm2534_vm1, %v2533_v1 }
 0x5bf   :  { %2260 = vmatprep.subr.bf16.mxu0 %v2532_v0 }
 0x5c0   :  { %v526_v45 = vld [vmem:[#allocation2 + $0x2] sm:$0x3] }
 0x5c1   :  { %2109 = vmatmul.mubr.msk.f32.vlgmr.msra.gmra.mrb[4].mxu1 %vm61_vm2, %v526_v45  ;;  %v689_v56 = vld [vmem:[#allocation3] sm:$0x3] }
 0x5c2   :  { %2262 = vmatpush3.bf16.msra.mxu0 %v2603_v12  ;;  %2265 = vmatpush3.bf16.msra.mxu1 %v2600_v9 }
 0x5c3   :  { %2266 = vmatprep.subr.bf16.mxu1 %v2532_v0  ;;  %2130 = vmatprep.mubr.msk.f32.mxu1 %vm2534_vm1, %v2533_v1 }
 0x5c4   :  { %2269 = vmatprep.subr.bf16.mxu0 %v2532_v0  ;;  %v690_v57 = vld [vmem:[#allocation3 + $0x2] sm:$0x3] }
 0x5c6   :  { %2268 = vmatpush3.bf16.msra.mxu1 %v2607_v14 }
 0x5c7   :  { %2275 = vmatprep.subr.bf16.mxu1 %v2532_v0 }
 0x690   :  { %v596_v47 = vpop.f32.mrb[4].mxu0 }
 0x691   :  { %v673_v48 = vadd.f32 %v596_v47, %v523_v46  ;;  %v2099_v49 = vpop.f32.mrb[5].mxu0 }
 0x693   :  { %2360 = vtanh.f32 %v673_v48  ;;  %v1943_v58 = vmul.f32 -1.442695, %v673_v48 }
 0x694   :  { %v669_v51 = vpop.f32.mrb[4].mxu1 }
 0x695   :  { %v674_v52 = vadd.f32 %v669_v51, %v524_v50  ;;  %v2110_v53 = vpop.f32.mrb[5].mxu1 }
 0x697   :  { %2362 = vtanh.f32 %v674_v52  ;;  %v1944_v59 = vmul.f32 -1.442695, %v674_v52 }
 0x698   :  { %2364 = vpow2.f32 %v1943_v58 }
 0x699   :  { %2366 = vpow2.f32 %v1944_v59 }
 0x69d   :  { %v2361_v54 = vpop.eup %2360 }
 0x69e   :  { %703 = vrot.lane.b32.xlu0 %v2361_v54, %s2535_s1 }
 0x6a1   :  { %v2363_v55 = vpop.eup %2362 }
 0x6a2   :  { %705 = vrot.lane.b32.xlu1 %v2363_v55, %s2535_s1  ;;  %693 = vrot.lane.b32.xlu0 %v689_v56, %s2535_s1  ;;  %v2365_v60 = vpop.eup %2364 }
 0x6a3   :  { %v681_v61 = vadd.f32 1.0, %v2365_v60  ;;  %v2367_v62 = vpop.eup %2366 }
 0x6a4   :  { %v682_v63 = vadd.f32 1.0, %v2367_v62 }
 0x6a5   :  { %2368 = vrcp.f32 %v681_v61 }
 0x6a6   :  { %695 = vrot.lane.b32.xlu1 %v690_v57, %s2535_s1  ;;  %2370 = vrcp.f32 %v682_v63 }
 0x6af   :  { %v2369_v2 = vpop.eup %2368 }
 0x6b0   :  { %v2371_v6 = vpop.eup %2370 }
 0x710   :  { %v704_v3 = vpop.permute.xlu0 %703 }
 0x711   :  { %v709_v4 = vmul.f32 %v2369_v2, %v704_v3 }
 0x713   :  { %713 = vrot.lane.b32.xlu0 %v709_v4, %s2535_s1 }
 0x714   :  { %v706_v7 = vpop.permute.xlu1 %705  ;;  %v694_v10 = vpop.permute.xlu0 %693 }
 0x715   :  { %v710_v8 = vmul.f32 %v2371_v6, %v706_v7  ;;  %v699_v11 = vmul.f32 %v2369_v2, %v694_v10 }
 0x717   :  { %715 = vrot.lane.b32.xlu1 %v710_v8, %s2535_s1 }
 0x718   :  { %v696_v13 = vpop.permute.xlu1 %695 }
 0x719   :  { %v700_v17 = vmul.f32 %v2371_v6, %v696_v13 }
 0x785   :  { %v714_v15 = vpop.permute.xlu0 %713 }
 0x786   :  { %v719_v16 = vadd.f32 %v714_v15, %v699_v11 }
 0x788   :  { %2372 = vtanh.f32 %v719_v16 }
 0x789   :  { %v716_v18 = vpop.permute.xlu1 %715 }
 0x78a   :  { %v720_v19 = vadd.f32 %v716_v18, %v700_v17  ;;  %v987_v18 = vld [vmem:[#allocation4 + $0x8] sm:$0x3] }
 0x78c   :  { %2374 = vtanh.f32 %v720_v19 }
 0x792   :  { %v2373_v20 = vpop.eup %2372 }
 0x793   :  { %725 = vrot.lane.b32.xlu0 %v2373_v20, %s2535_s1 }
 0x796   :  { %v2375_v21 = vpop.eup %2374 }
 0x797   :  { %727 = vrot.lane.b32.xlu1 %v2375_v21, %s2535_s1 }
 0x805   :  { %v726_v22 = vpop.permute.xlu0 %725 }
 0x806   :  { %v731_v23 = vmul.f32 %v2369_v2, %v726_v22  ;;  %v988_v22 = vld [vmem:[#allocation4 + $0x18] sm:$0x3] }
 0x808   :  { %745 = vrot.lane.b32.xlu0 %v731_v23, %s2536_s6 }
 0x809   :  { %v728_v24 = vpop.permute.xlu1 %727 }
 0x80a   :  { %v732_v25 = vmul.f32 %v2371_v6, %v728_v24 }
 0x80c   :  { %747 = vrot.lane.b32.xlu1 %v732_v25, %s2536_s6  ;;  %735 = vrot.lane.b32.xlu0 %v719_v16, %s2537_s7 }
 0x810   :  { %737 = vrot.lane.b32.xlu1 %v720_v19, %s2537_s7 }
 0x87a   :  { %v746_v26 = vpop.permute.xlu0 %745 }
 0x87b   :  { %751 = vst.msk [vmem:[#allocation2] sm:$0x3] %vm44_vm0, %v746_v26  ;;  %753 = vst.msk [vmem:[#allocation9 + $0x4] sm:$0x3] %vm44_vm0, %v746_v26 }
 0x87e   :  { %v748_v27 = vpop.permute.xlu1 %747  ;;  %v736_v28 = vpop.permute.xlu0 %735 }
 0x87f   :  { %752 = vst.msk [vmem:[#allocation2 + $0x2] sm:$0x3] %vm44_vm0, %v748_v27  ;;  %754 = vst.msk [vmem:[#allocation9 + $0x14] sm:$0x3] %vm44_vm0, %v748_v27 }
 0x880   :  { %741 = vst.msk [vmem:[#allocation3] sm:$0x3] %vm44_vm0, %v736_v28 }
 0x882   :  { %v738_v29 = vpop.permute.xlu1 %737  ;;  %v757_v30 = vld [vmem:[#allocation2] sm:$0x3] }
 0x883   :  { %742 = vst.msk [vmem:[#allocation3 + $0x2] sm:$0x3] %vm44_vm0, %v738_v29  ;;  %2120 = vmatmul.mubr.msk.f32.vlgmr.msra.gmra.mrb[6].mxu0 %vm61_vm2, %v757_v30 }
 0x884   :  { %2271 = vmatpush3.bf16.msra.mxu0 %v2598_v5  ;;  %2141 = vmatprep.mubr.msk.f32.mxu0 %vm2534_vm1, %v2533_v1 }
 0x885   :  { %2272 = vmatprep.subr.bf16.mxu0 %v2532_v0 }
 0x886   :  { %v758_v31 = vld [vmem:[#allocation2 + $0x2] sm:$0x3] }
 0x887   :  { %2131 = vmatmul.mubr.msk.f32.vlgmr.msra.gmra.mrb[6].mxu1 %vm61_vm2, %v758_v31  ;;  %v921_v42 = vld [vmem:[#allocation3] sm:$0x3] }
 0x888   :  { %2274 = vmatpush3.bf16.msra.mxu0 %v2603_v12  ;;  %2277 = vmatpush3.bf16.msra.mxu1 %v2600_v9 }
 0x889   :  { %2278 = vmatprep.subr.bf16.mxu1 %v2532_v0  ;;  %2152 = vmatprep.mubr.msk.f32.mxu1 %vm2534_vm1, %v2533_v1 }
 0x88a   :  { %2281 = vmatprep.subr.bf16.mxu0 %v2532_v0  ;;  %v922_v43 = vld [vmem:[#allocation3 + $0x2] sm:$0x3] }
 0x88c   :  { %2280 = vmatpush3.bf16.msra.mxu1 %v2607_v14 }
 0x88d   :  { %2287 = vmatprep.subr.bf16.mxu1 %v2532_v0 }
 0x956   :  { %v828_v33 = vpop.f32.mrb[6].mxu0 }
 0x957   :  { %v905_v34 = vadd.f32 %v828_v33, %v755_v32  ;;  %v2121_v35 = vpop.f32.mrb[7].mxu0 }
 0x959   :  { %2376 = vtanh.f32 %v905_v34  ;;  %v1947_v44 = vmul.f32 -1.442695, %v905_v34 }
 0x95a   :  { %v901_v37 = vpop.f32.mrb[6].mxu1 }
 0x95b   :  { %v906_v38 = vadd.f32 %v901_v37, %v756_v36  ;;  %v2132_v39 = vpop.f32.mrb[7].mxu1 }
 0x95d   :  { %2378 = vtanh.f32 %v906_v38  ;;  %v1948_v45 = vmul.f32 -1.442695, %v906_v38 }
 0x95e   :  { %2380 = vpow2.f32 %v1947_v44 }
 0x95f   :  { %2382 = vpow2.f32 %v1948_v45 }
 0x963   :  { %v2377_v40 = vpop.eup %2376 }
 0x964   :  { %935 = vrot.lane.b32.xlu0 %v2377_v40, %s2535_s1 }
 0x967   :  { %v2379_v41 = vpop.eup %2378 }
 0x968   :  { %937 = vrot.lane.b32.xlu1 %v2379_v41, %s2535_s1  ;;  %925 = vrot.lane.b32.xlu0 %v921_v42, %s2535_s1  ;;  %v2381_v46 = vpop.eup %2380 }
 0x969   :  { %v913_v47 = vadd.f32 1.0, %v2381_v46  ;;  %v2383_v48 = vpop.eup %2382 }
 0x96a   :  { %v914_v49 = vadd.f32 1.0, %v2383_v48 }
 0x96b   :  { %2384 = vrcp.f32 %v913_v47 }
 0x96c   :  { %927 = vrot.lane.b32.xlu1 %v922_v43, %s2535_s1  ;;  %2386 = vrcp.f32 %v914_v49 }
 0x975   :  { %v2385_v50 = vpop.eup %2384 }
 0x976   :  { %v2387_v53 = vpop.eup %2386 }
 0x9d6   :  { %v936_v51 = vpop.permute.xlu0 %935 }
 0x9d7   :  { %v941_v52 = vmul.f32 %v2385_v50, %v936_v51 }
 0x9d9   :  { %945 = vrot.lane.b32.xlu0 %v941_v52, %s2535_s1 }
 0x9da   :  { %v938_v54 = vpop.permute.xlu1 %937  ;;  %v926_v56 = vpop.permute.xlu0 %925 }
 0x9db   :  { %v942_v55 = vmul.f32 %v2387_v53, %v938_v54  ;;  %v931_v57 = vmul.f32 %v2385_v50, %v926_v56 }
 0x9dd   :  { %947 = vrot.lane.b32.xlu1 %v942_v55, %s2535_s1 }
 0x9de   :  { %v928_v58 = vpop.permute.xlu1 %927 }
 0x9df   :  { %v932_v61 = vmul.f32 %v2387_v53, %v928_v58 }
 0xa4b   :  { %v946_v59 = vpop.permute.xlu0 %945 }
 0xa4c   :  { %v951_v60 = vadd.f32 %v946_v59, %v931_v57 }
 0xa4e   :  { %2388 = vtanh.f32 %v951_v60 }
 0xa4f   :  { %v948_v62 = vpop.permute.xlu1 %947 }
 0xa50   :  { %v952_v63 = vadd.f32 %v948_v62, %v932_v61  ;;  %v1219_v62 = vld [vmem:[#allocation4 + $0xa] sm:$0x3] }
 0xa52   :  { %2390 = vtanh.f32 %v952_v63 }
 0xa58   :  { %v2389_v2 = vpop.eup %2388 }
 0xa59   :  { %957 = vrot.lane.b32.xlu0 %v2389_v2, %s2535_s1 }
 0xa5c   :  { %v2391_v3 = vpop.eup %2390 }
 0xa5d   :  { %959 = vrot.lane.b32.xlu1 %v2391_v3, %s2535_s1 }
 0xacb   :  { %v958_v4 = vpop.permute.xlu0 %957 }
 0xacc   :  { %v963_v6 = vmul.f32 %v2385_v50, %v958_v4  ;;  %v1220_v4 = vld [vmem:[#allocation4 + $0x1a] sm:$0x3] }
 0xace   :  { %977 = vrot.lane.b32.xlu0 %v963_v6, %s2536_s6 }
 0xacf   :  { %v960_v7 = vpop.permute.xlu1 %959 }
 0xad0   :  { %v964_v8 = vmul.f32 %v2387_v53, %v960_v7 }
 0xad2   :  { %979 = vrot.lane.b32.xlu1 %v964_v8, %s2536_s6  ;;  %967 = vrot.lane.b32.xlu0 %v951_v60, %s2537_s7 }
 0xad6   :  { %969 = vrot.lane.b32.xlu1 %v952_v63, %s2537_s7 }
 0xb40   :  { %v978_v10 = vpop.permute.xlu0 %977 }
 0xb41   :  { %983 = vst.msk [vmem:[#allocation2] sm:$0x3] %vm44_vm0, %v978_v10  ;;  %985 = vst.msk [vmem:[#allocation9 + $0x6] sm:$0x3] %vm44_vm0, %v978_v10 }
 0xb44   :  { %v980_v11 = vpop.permute.xlu1 %979  ;;  %v968_v13 = vpop.permute.xlu0 %967 }
 0xb45   :  { %984 = vst.msk [vmem:[#allocation2 + $0x2] sm:$0x3] %vm44_vm0, %v980_v11  ;;  %986 = vst.msk [vmem:[#allocation9 + $0x16] sm:$0x3] %vm44_vm0, %v980_v11 }
 0xb46   :  { %973 = vst.msk [vmem:[#allocation3] sm:$0x3] %vm44_vm0, %v968_v13 }
 0xb48   :  { %v970_v15 = vpop.permute.xlu1 %969  ;;  %v989_v16 = vld [vmem:[#allocation2] sm:$0x3] }
 0xb49   :  { %974 = vst.msk [vmem:[#allocation3 + $0x2] sm:$0x3] %vm44_vm0, %v970_v15  ;;  %2142 = vmatmul.mubr.msk.f32.vlgmr.msra.gmra.mrb[8].mxu0 %vm61_vm2, %v989_v16 }
 0xb4a   :  { %2283 = vmatpush3.bf16.msra.mxu0 %v2598_v5  ;;  %2163 = vmatprep.mubr.msk.f32.mxu0 %vm2534_vm1, %v2533_v1 }
 0xb4b   :  { %2284 = vmatprep.subr.bf16.mxu0 %v2532_v0 }
 0xb4c   :  { %v990_v17 = vld [vmem:[#allocation2 + $0x2] sm:$0x3] }
 0xb4d   :  { %2153 = vmatmul.mubr.msk.f32.vlgmr.msra.gmra.mrb[8].mxu1 %vm61_vm2, %v990_v17  ;;  %v1153_v28 = vld [vmem:[#allocation3] sm:$0x3] }
 0xb4e   :  { %2286 = vmatpush3.bf16.msra.mxu0 %v2603_v12  ;;  %2289 = vmatpush3.bf16.msra.mxu1 %v2600_v9 }
 0xb4f   :  { %2290 = vmatprep.subr.bf16.mxu1 %v2532_v0  ;;  %2174 = vmatprep.mubr.msk.f32.mxu1 %vm2534_vm1, %v2533_v1 }
 0xb50   :  { %2293 = vmatprep.subr.bf16.mxu0 %v2532_v0  ;;  %v1154_v29 = vld [vmem:[#allocation3 + $0x2] sm:$0x3] }
 0xb52   :  { %2292 = vmatpush3.bf16.msra.mxu1 %v2607_v14 }
 0xb53   :  { %2299 = vmatprep.subr.bf16.mxu1 %v2532_v0 }
 0xc1c   :  { %v1060_v19 = vpop.f32.mrb[8].mxu0 }
 0xc1d   :  { %v1137_v20 = vadd.f32 %v1060_v19, %v987_v18  ;;  %v2143_v21 = vpop.f32.mrb[9].mxu0 }
 0xc1f   :  { %2392 = vtanh.f32 %v1137_v20  ;;  %v1951_v30 = vmul.f32 -1.442695, %v1137_v20 }
 0xc20   :  { %v1133_v23 = vpop.f32.mrb[8].mxu1 }
 0xc21   :  { %v1138_v24 = vadd.f32 %v1133_v23, %v988_v22  ;;  %v2154_v25 = vpop.f32.mrb[9].mxu1 }
 0xc23   :  { %2394 = vtanh.f32 %v1138_v24  ;;  %v1952_v31 = vmul.f32 -1.442695, %v1138_v24 }
 0xc24   :  { %2396 = vpow2.f32 %v1951_v30 }
 0xc25   :  { %2398 = vpow2.f32 %v1952_v31 }
 0xc29   :  { %v2393_v26 = vpop.eup %2392 }
 0xc2a   :  { %1167 = vrot.lane.b32.xlu0 %v2393_v26, %s2535_s1 }
 0xc2d   :  { %v2395_v27 = vpop.eup %2394 }
 0xc2e   :  { %1169 = vrot.lane.b32.xlu1 %v2395_v27, %s2535_s1  ;;  %1157 = vrot.lane.b32.xlu0 %v1153_v28, %s2535_s1  ;;  %v2397_v32 = vpop.eup %2396 }
 0xc2f   :  { %v1145_v33 = vadd.f32 1.0, %v2397_v32  ;;  %v2399_v34 = vpop.eup %2398 }
 0xc30   :  { %v1146_v35 = vadd.f32 1.0, %v2399_v34 }
 0xc31   :  { %2400 = vrcp.f32 %v1145_v33 }
 0xc32   :  { %1159 = vrot.lane.b32.xlu1 %v1154_v29, %s2535_s1  ;;  %2402 = vrcp.f32 %v1146_v35 }
 0xc3b   :  { %v2401_v36 = vpop.eup %2400 }
 0xc3c   :  { %v2403_v39 = vpop.eup %2402 }
 0xc9c   :  { %v1168_v37 = vpop.permute.xlu0 %1167 }
 0xc9d   :  { %v1173_v38 = vmul.f32 %v2401_v36, %v1168_v37 }
 0xc9f   :  { %1177 = vrot.lane.b32.xlu0 %v1173_v38, %s2535_s1 }
 0xca0   :  { %v1170_v40 = vpop.permute.xlu1 %1169  ;;  %v1158_v42 = vpop.permute.xlu0 %1157 }
 0xca1   :  { %v1174_v41 = vmul.f32 %v2403_v39, %v1170_v40  ;;  %v1163_v43 = vmul.f32 %v2401_v36, %v1158_v42 }
 0xca3   :  { %1179 = vrot.lane.b32.xlu1 %v1174_v41, %s2535_s1 }
 0xca4   :  { %v1160_v44 = vpop.permute.xlu1 %1159 }
 0xca5   :  { %v1164_v47 = vmul.f32 %v2403_v39, %v1160_v44 }
 0xd11   :  { %v1178_v45 = vpop.permute.xlu0 %1177 }
 0xd12   :  { %v1183_v46 = vadd.f32 %v1178_v45, %v1163_v43 }
 0xd14   :  { %2404 = vtanh.f32 %v1183_v46 }
 0xd15   :  { %v1180_v48 = vpop.permute.xlu1 %1179 }
 0xd16   :  { %v1184_v49 = vadd.f32 %v1180_v48, %v1164_v47 }
 0xd18   :  { %2406 = vtanh.f32 %v1184_v49 }
 0xd1e   :  { %v2405_v50 = vpop.eup %2404 }
 0xd1f   :  { %1189 = vrot.lane.b32.xlu0 %v2405_v50, %s2535_s1 }
 0xd22   :  { %v2407_v51 = vpop.eup %2406 }
 0xd23   :  { %1191 = vrot.lane.b32.xlu1 %v2407_v51, %s2535_s1  ;;  %v1452_v51 = vld [vmem:[#allocation4 + $0x1c] sm:$0x3] }
 0xd91   :  { %v1190_v52 = vpop.permute.xlu0 %1189 }
 0xd92   :  { %v1195_v53 = vmul.f32 %v2401_v36, %v1190_v52 }
 0xd94   :  { %1209 = vrot.lane.b32.xlu0 %v1195_v53, %s2536_s6 }
 0xd95   :  { %v1192_v54 = vpop.permute.xlu1 %1191 }
 0xd96   :  { %v1196_v55 = vmul.f32 %v2403_v39, %v1192_v54 }
 0xd98   :  { %1211 = vrot.lane.b32.xlu1 %v1196_v55, %s2536_s6  ;;  %1199 = vrot.lane.b32.xlu0 %v1183_v46, %s2537_s7 }
 0xd9c   :  { %1201 = vrot.lane.b32.xlu1 %v1184_v49, %s2537_s7 }
 0xe06   :  { %v1210_v56 = vpop.permute.xlu0 %1209 }
 0xe07   :  { %1215 = vst.msk [vmem:[#allocation2] sm:$0x3] %vm44_vm0, %v1210_v56  ;;  %1217 = vst.msk [vmem:[#allocation9 + $0x8] sm:$0x3] %vm44_vm0, %v1210_v56 }
 0xe0a   :  { %v1212_v57 = vpop.permute.xlu1 %1211  ;;  %v1200_v58 = vpop.permute.xlu0 %1199 }
 0xe0b   :  { %1216 = vst.msk [vmem:[#allocation2 + $0x2] sm:$0x3] %vm44_vm0, %v1212_v57  ;;  %1218 = vst.msk [vmem:[#allocation9 + $0x18] sm:$0x3] %vm44_vm0, %v1212_v57 }
 0xe0c   :  { %1205 = vst.msk [vmem:[#allocation3] sm:$0x3] %vm44_vm0, %v1200_v58 }
 0xe0e   :  { %v1202_v59 = vpop.permute.xlu1 %1201  ;;  %v1221_v60 = vld [vmem:[#allocation2] sm:$0x3] }
 0xe0f   :  { %1206 = vst.msk [vmem:[#allocation3 + $0x2] sm:$0x3] %vm44_vm0, %v1202_v59  ;;  %2164 = vmatmul.mubr.msk.f32.vlgmr.msra.gmra.mrb[10].mxu0 %vm61_vm2, %v1221_v60 }
 0xe10   :  { %2295 = vmatpush3.bf16.msra.mxu0 %v2598_v5  ;;  %2185 = vmatprep.mubr.msk.f32.mxu0 %vm2534_vm1, %v2533_v1 }
 0xe11   :  { %2296 = vmatprep.subr.bf16.mxu0 %v2532_v0 }
 0xe12   :  { %v1222_v61 = vld [vmem:[#allocation2 + $0x2] sm:$0x3] }
 0xe13   :  { %2175 = vmatmul.mubr.msk.f32.vlgmr.msra.gmra.mrb[10].mxu1 %vm61_vm2, %v1222_v61  ;;  %v1385_v13 = vld [vmem:[#allocation3] sm:$0x3] }
 0xe14   :  { %2298 = vmatpush3.bf16.msra.mxu0 %v2603_v12  ;;  %2301 = vmatpush3.bf16.msra.mxu1 %v2600_v9 }
 0xe15   :  { %2302 = vmatprep.subr.bf16.mxu1 %v2532_v0  ;;  %2196 = vmatprep.mubr.msk.f32.mxu1 %vm2534_vm1, %v2533_v1 }
 0xe16   :  { %2305 = vmatprep.subr.bf16.mxu0 %v2532_v0  ;;  %v1386_v15 = vld [vmem:[#allocation3 + $0x2] sm:$0x3] }
 0xe18   :  { %2304 = vmatpush3.bf16.msra.mxu1 %v2607_v14 }
 0xe19   :  { %2311 = vmatprep.subr.bf16.mxu1 %v2532_v0 }
 0xee2   :  { %v1292_v63 = vpop.f32.mrb[10].mxu0 }
 0xee3   :  { %v1369_v2 = vadd.f32 %v1292_v63, %v1219_v62  ;;  %v2165_v3 = vpop.f32.mrb[11].mxu0 }
 0xee5   :  { %2408 = vtanh.f32 %v1369_v2  ;;  %v1955_v16 = vmul.f32 -1.442695, %v1369_v2 }
 0xee6   :  { %v1365_v6 = vpop.f32.mrb[10].mxu1 }
 0xee7   :  { %v1370_v7 = vadd.f32 %v1365_v6, %v1220_v4  ;;  %v2176_v8 = vpop.f32.mrb[11].mxu1 }
 0xee9   :  { %2410 = vtanh.f32 %v1370_v7  ;;  %v1956_v17 = vmul.f32 -1.442695, %v1370_v7 }
 0xeea   :  { %2412 = vpow2.f32 %v1955_v16 }
 0xeeb   :  { %2414 = vpow2.f32 %v1956_v17 }
 0xeef   :  { %v2409_v10 = vpop.eup %2408 }
 0xef0   :  { %1399 = vrot.lane.b32.xlu0 %v2409_v10, %s2535_s1 }
 0xef3   :  { %v2411_v11 = vpop.eup %2410 }
 0xef4   :  { %1401 = vrot.lane.b32.xlu1 %v2411_v11, %s2535_s1  ;;  %1389 = vrot.lane.b32.xlu0 %v1385_v13, %s2535_s1  ;;  %v2413_v18 = vpop.eup %2412 }
 0xef5   :  { %v1377_v19 = vadd.f32 1.0, %v2413_v18  ;;  %v2415_v20 = vpop.eup %2414 }
 0xef6   :  { %v1378_v21 = vadd.f32 1.0, %v2415_v20 }
 0xef7   :  { %2416 = vrcp.f32 %v1377_v19 }
 0xef8   :  { %1391 = vrot.lane.b32.xlu1 %v1386_v15, %s2535_s1  ;;  %2418 = vrcp.f32 %v1378_v21 }
 0xf01   :  { %v2417_v22 = vpop.eup %2416 }
 0xf02   :  { %v2419_v25 = vpop.eup %2418 }
 0xf62   :  { %v1400_v23 = vpop.permute.xlu0 %1399 }
 0xf63   :  { %v1405_v24 = vmul.f32 %v2417_v22, %v1400_v23 }
 0xf65   :  { %1409 = vrot.lane.b32.xlu0 %v1405_v24, %s2535_s1 }
 0xf66   :  { %v1402_v26 = vpop.permute.xlu1 %1401  ;;  %v1390_v28 = vpop.permute.xlu0 %1389 }
 0xf67   :  { %v1406_v27 = vmul.f32 %v2419_v25, %v1402_v26  ;;  %v1395_v29 = vmul.f32 %v2417_v22, %v1390_v28  ;;  %v1683_v28 = vld [vmem:[#allocation4 + $0xe] sm:$0x3] }
 0xf69   :  { %1411 = vrot.lane.b32.xlu1 %v1406_v27, %s2535_s1 }
 0xf6a   :  { %v1392_v30 = vpop.permute.xlu1 %1391 }
 0xf6b   :  { %v1396_v33 = vmul.f32 %v2419_v25, %v1392_v30 }
 0xfd7   :  { %v1410_v31 = vpop.permute.xlu0 %1409 }
 0xfd8   :  { %v1415_v32 = vadd.f32 %v1410_v31, %v1395_v29 }
 0xfda   :  { %2420 = vtanh.f32 %v1415_v32 }
 0xfdb   :  { %v1412_v34 = vpop.permute.xlu1 %1411 }
 0xfdc   :  { %v1416_v35 = vadd.f32 %v1412_v34, %v1396_v33 }
 0xfde   :  { %2422 = vtanh.f32 %v1416_v35 }
 0xfe4   :  { %v2421_v36 = vpop.eup %2420 }
 0xfe5   :  { %1421 = vrot.lane.b32.xlu0 %v2421_v36, %s2535_s1 }
 0xfe8   :  { %v2423_v37 = vpop.eup %2422 }
 0xfe9   :  { %1423 = vrot.lane.b32.xlu1 %v2423_v37, %s2535_s1 }
0x1057   :  { %v1422_v38 = vpop.permute.xlu0 %1421 }
0x1058   :  { %v1427_v39 = vmul.f32 %v2417_v22, %v1422_v38 }
0x105a   :  { %1441 = vrot.lane.b32.xlu0 %v1427_v39, %s2536_s6 }
0x105b   :  { %v1424_v40 = vpop.permute.xlu1 %1423 }
0x105c   :  { %v1428_v41 = vmul.f32 %v2419_v25, %v1424_v40 }
0x105e   :  { %1443 = vrot.lane.b32.xlu1 %v1428_v41, %s2536_s6  ;;  %1431 = vrot.lane.b32.xlu0 %v1415_v32, %s2537_s7  ;;  %v1684_v32 = vld [vmem:[#allocation4 + $0x1e] sm:$0x3] }
0x1062   :  { %1433 = vrot.lane.b32.xlu1 %v1416_v35, %s2537_s7 }
0x10cc   :  { %v1442_v42 = vpop.permute.xlu0 %1441 }
0x10cd   :  { %1447 = vst.msk [vmem:[#allocation2] sm:$0x3] %vm44_vm0, %v1442_v42  ;;  %1449 = vst.msk [vmem:[#allocation9 + $0xa] sm:$0x3] %vm44_vm0, %v1442_v42 }
0x10d0   :  { %v1444_v43 = vpop.permute.xlu1 %1443  ;;  %v1432_v44 = vpop.permute.xlu0 %1431 }
0x10d1   :  { %1448 = vst.msk [vmem:[#allocation2 + $0x2] sm:$0x3] %vm44_vm0, %v1444_v43  ;;  %1450 = vst.msk [vmem:[#allocation9 + $0x1a] sm:$0x3] %vm44_vm0, %v1444_v43 }
0x10d2   :  { %1437 = vst.msk [vmem:[#allocation3] sm:$0x3] %vm44_vm0, %v1432_v44 }
0x10d4   :  { %v1434_v45 = vpop.permute.xlu1 %1433  ;;  %v1453_v46 = vld [vmem:[#allocation2] sm:$0x3] }
0x10d5   :  { %1438 = vst.msk [vmem:[#allocation3 + $0x2] sm:$0x3] %vm44_vm0, %v1434_v45  ;;  %2186 = vmatmul.mubr.msk.f32.vlgmr.msra.gmra.mrb[12].mxu0 %vm61_vm2, %v1453_v46 }
0x10d6   :  { %2307 = vmatpush3.bf16.msra.mxu0 %v2598_v5  ;;  %2207 = vmatprep.mubr.msk.f32.mxu0 %vm2534_vm1, %v2533_v1  ;;  %v1451_v5 = vld [vmem:[#allocation4 + $0xc] sm:$0x3] }
0x10d7   :  { %2308 = vmatprep.subr.bf16.mxu0 %v2532_v0 }
0x10d8   :  { %v1454_v47 = vld [vmem:[#allocation2 + $0x2] sm:$0x3] }
0x10d9   :  { %2197 = vmatmul.mubr.msk.f32.vlgmr.msra.gmra.mrb[12].mxu1 %vm61_vm2, %v1454_v47 }
0x10da   :  { %2310 = vmatpush3.bf16.msra.mxu0 %v2603_v12  ;;  %2313 = vmatpush3.bf16.msra.mxu1 %v2600_v9 }
0x10db   :  { %2314 = vmatprep.subr.bf16.mxu1 %v2532_v0  ;;  %2218 = vmatprep.mubr.msk.f32.mxu1 %vm2534_vm1, %v2533_v1  ;;  %v1617_v0 = vld [vmem:[#allocation3] sm:$0x3] }
0x10dc   :  { %v1618_v1 = vld [vmem:[#allocation3 + $0x2] sm:$0x3] }
0x10de   :  { %2316 = vmatpush3.bf16.msra.mxu1 %v2607_v14 }
0x11a8   :  { %v1524_v48 = vpop.f32.mrb[12].mxu0 }
0x11a9   :  { %v1601_v49 = vadd.f32 %v1524_v48, %v1451_v5  ;;  %v2187_v50 = vpop.f32.mrb[13].mxu0 }
0x11ab   :  { %2424 = vtanh.f32 %v1601_v49  ;;  %v1959_v14 = vmul.f32 -1.442695, %v1601_v49 }
0x11ac   :  { %v1597_v52 = vpop.f32.mrb[12].mxu1 }
0x11ad   :  { %v1602_v53 = vadd.f32 %v1597_v52, %v1452_v51  ;;  %v2198_v54 = vpop.f32.mrb[13].mxu1 }
0x11af   :  { %2426 = vtanh.f32 %v1602_v53  ;;  %v1960_v55 = vmul.f32 -1.442695, %v1602_v53 }
0x11b0   :  { %2428 = vpow2.f32 %v1959_v14 }
0x11b1   :  { %2430 = vpow2.f32 %v1960_v55 }
0x11b5   :  { %v2425_v12 = vpop.eup %2424 }
0x11b6   :  { %1631 = vrot.lane.b32.xlu0 %v2425_v12, %s2535_s1 }
0x11b9   :  { %v2427_v9 = vpop.eup %2426 }
0x11ba   :  { %1633 = vrot.lane.b32.xlu1 %v2427_v9, %s2535_s1  ;;  %1621 = vrot.lane.b32.xlu0 %v1617_v0, %s2535_s1  ;;  %v2429_v56 = vpop.eup %2428 }
0x11bb   :  { %v1609_v57 = vadd.f32 1.0, %v2429_v56  ;;  %v2431_v58 = vpop.eup %2430 }
0x11bc   :  { %v1610_v59 = vadd.f32 1.0, %v2431_v58 }
0x11bd   :  { %2432 = vrcp.f32 %v1609_v57 }
0x11be   :  { %1623 = vrot.lane.b32.xlu1 %v1618_v1, %s2535_s1  ;;  %2434 = vrcp.f32 %v1610_v59 }
0x11c7   :  { %v2433_v60 = vpop.eup %2432 }
0x11c8   :  { %v2435_v63 = vpop.eup %2434 }
0x1228   :  { %v1632_v61 = vpop.permute.xlu0 %1631 }
0x1229   :  { %v1637_v62 = vmul.f32 %v2433_v60, %v1632_v61 }
0x122b   :  { %1641 = vrot.lane.b32.xlu0 %v1637_v62, %s2535_s1 }
0x122c   :  { %v1634_v2 = vpop.permute.xlu1 %1633  ;;  %v1622_v4 = vpop.permute.xlu0 %1621 }
0x122d   :  { %v1638_v3 = vmul.f32 %v2435_v63, %v1634_v2  ;;  %v1627_v6 = vmul.f32 %v2433_v60, %v1622_v4 }
0x122f   :  { %1643 = vrot.lane.b32.xlu1 %v1638_v3, %s2535_s1 }
0x1230   :  { %v1624_v7 = vpop.permute.xlu1 %1623 }
0x1231   :  { %v1628_v11 = vmul.f32 %v2435_v63, %v1624_v7 }
0x129d   :  { %v1642_v8 = vpop.permute.xlu0 %1641 }
0x129e   :  { %v1647_v10 = vadd.f32 %v1642_v8, %v1627_v6 }
0x12a0   :  { %2436 = vtanh.f32 %v1647_v10 }
0x12a1   :  { %v1644_v13 = vpop.permute.xlu1 %1643 }
0x12a2   :  { %v1648_v15 = vadd.f32 %v1644_v13, %v1628_v11 }
0x12a4   :  { %2438 = vtanh.f32 %v1648_v15 }
0x12aa   :  { %v2437_v16 = vpop.eup %2436 }
0x12ab   :  { %1653 = vrot.lane.b32.xlu0 %v2437_v16, %s2535_s1 }
0x12ae   :  { %v2439_v17 = vpop.eup %2438 }
0x12af   :  { %1655 = vrot.lane.b32.xlu1 %v2439_v17, %s2535_s1 }
0x131d   :  { %v1654_v18 = vpop.permute.xlu0 %1653 }
0x131e   :  { %v1659_v19 = vmul.f32 %v2433_v60, %v1654_v18 }
0x1320   :  { %1673 = vrot.lane.b32.xlu0 %v1659_v19, %s2536_s6 }
0x1321   :  { %v1656_v20 = vpop.permute.xlu1 %1655 }
0x1322   :  { %v1660_v21 = vmul.f32 %v2435_v63, %v1656_v20 }
0x1324   :  { %1675 = vrot.lane.b32.xlu1 %v1660_v21, %s2536_s6  ;;  %1663 = vrot.lane.b32.xlu0 %v1647_v10, %s2537_s7 }
0x1328   :  { %1665 = vrot.lane.b32.xlu1 %v1648_v15, %s2537_s7 }
0x1392   :  { %v1674_v22 = vpop.permute.xlu0 %1673 }
0x1393   :  { %1679 = vst.msk [vmem:[#allocation2] sm:$0x3] %vm44_vm0, %v1674_v22  ;;  %1681 = vst.msk [vmem:[#allocation9 + $0xc] sm:$0x3] %vm44_vm0, %v1674_v22 }
0x1396   :  { %v1676_v23 = vpop.permute.xlu1 %1675  ;;  %v1664_v24 = vpop.permute.xlu0 %1663 }
0x1397   :  { %1680 = vst.msk [vmem:[#allocation2 + $0x2] sm:$0x3] %vm44_vm0, %v1676_v23  ;;  %1682 = vst.msk [vmem:[#allocation9 + $0x1c] sm:$0x3] %vm44_vm0, %v1676_v23 }
0x1398   :  { %1669 = vst.msk [vmem:[#allocation3] sm:$0x3] %vm44_vm0, %v1664_v24 }
0x139a   :  { %v1666_v25 = vpop.permute.xlu1 %1665  ;;  %v1685_v26 = vld [vmem:[#allocation2] sm:$0x3] }
0x139b   :  { %1670 = vst.msk [vmem:[#allocation3 + $0x2] sm:$0x3] %vm44_vm0, %v1666_v25  ;;  %2208 = vmatmul.mubr.msk.f32.vlgmr.msra.gmra.mrb[14].mxu0 %vm61_vm2, %v1685_v26 }
0x139e   :  { %v1686_v27 = vld [vmem:[#allocation2 + $0x2] sm:$0x3] }
0x139f   :  { %2219 = vmatmul.mubr.msk.f32.vlgmr.msra.gmra.mrb[14].mxu1 %vm61_vm2, %v1686_v27  ;;  %v1849_v38 = vld [vmem:[#allocation3] sm:$0x3] }
0x13a2   :  { %v1850_v39 = vld [vmem:[#allocation3 + $0x2] sm:$0x3] }
0x146e   :  { %v1756_v29 = vpop.f32.mrb[14].mxu0 }
0x146f   :  { %v1833_v30 = vadd.f32 %v1756_v29, %v1683_v28  ;;  %v2209_v31 = vpop.f32.mrb[15].mxu0 }
0x1471   :  { %2440 = vtanh.f32 %v1833_v30  ;;  %v1963_v40 = vmul.f32 -1.442695, %v1833_v30 }
0x1472   :  { %v1829_v33 = vpop.f32.mrb[14].mxu1 }
0x1473   :  { %v1834_v34 = vadd.f32 %v1829_v33, %v1684_v32  ;;  %v2220_v35 = vpop.f32.mrb[15].mxu1 }
0x1475   :  { %2442 = vtanh.f32 %v1834_v34  ;;  %v1964_v41 = vmul.f32 -1.442695, %v1834_v34 }
0x1476   :  { %2444 = vpow2.f32 %v1963_v40 }
0x1477   :  { %2446 = vpow2.f32 %v1964_v41 }
0x147b   :  { %v2441_v36 = vpop.eup %2440 }
0x147c   :  { %1863 = vrot.lane.b32.xlu0 %v2441_v36, %s2535_s1 }
0x147f   :  { %v2443_v37 = vpop.eup %2442 }
0x1480   :  { %1865 = vrot.lane.b32.xlu1 %v2443_v37, %s2535_s1  ;;  %1853 = vrot.lane.b32.xlu0 %v1849_v38, %s2535_s1  ;;  %v2445_v42 = vpop.eup %2444 }
0x1481   :  { %v1841_v43 = vadd.f32 1.0, %v2445_v42  ;;  %v2447_v44 = vpop.eup %2446 }
0x1482   :  { %v1842_v45 = vadd.f32 1.0, %v2447_v44 }
0x1483   :  { %2448 = vrcp.f32 %v1841_v43 }
0x1484   :  { %1855 = vrot.lane.b32.xlu1 %v1850_v39, %s2535_s1  ;;  %2450 = vrcp.f32 %v1842_v45 }
0x148d   :  { %v2449_v46 = vpop.eup %2448 }
0x148e   :  { %v2451_v48 = vpop.eup %2450 }
0x14ee   :  { %v1864_v47 = vpop.permute.xlu0 %1863 }
0x14ef   :  { %v1869_v5 = vmul.f32 %v2449_v46, %v1864_v47 }
0x14f1   :  { %1873 = vrot.lane.b32.xlu0 %v1869_v5, %s2535_s1 }
0x14f2   :  { %v1866_v49 = vpop.permute.xlu1 %1865  ;;  %v1854_v51 = vpop.permute.xlu0 %1853 }
0x14f3   :  { %v1870_v50 = vmul.f32 %v2451_v48, %v1866_v49  ;;  %v1859_v52 = vmul.f32 %v2449_v46, %v1854_v51 }
0x14f5   :  { %1875 = vrot.lane.b32.xlu1 %v1870_v50, %s2535_s1 }
0x14f6   :  { %v1856_v53 = vpop.permute.xlu1 %1855 }
0x14f7   :  { %v1860_v9 = vmul.f32 %v2451_v48, %v1856_v53 }
0x1563   :  { %v1874_v54 = vpop.permute.xlu0 %1873 }
0x1564   :  { %v1879_v12 = vadd.f32 %v1874_v54, %v1859_v52 }
0x1566   :  { %2452 = vtanh.f32 %v1879_v12 }
0x1567   :  { %v1876_v0 = vpop.permute.xlu1 %1875 }
0x1568   :  { %v1880_v1 = vadd.f32 %v1876_v0, %v1860_v9 }
0x156a   :  { %2454 = vtanh.f32 %v1880_v1 }
0x1570   :  { %v2453_v14 = vpop.eup %2452 }
0x1571   :  { %1885 = vrot.lane.b32.xlu0 %v2453_v14, %s2535_s1 }
0x1574   :  { %v2455_v55 = vpop.eup %2454 }
0x1575   :  { %1887 = vrot.lane.b32.xlu1 %v2455_v55, %s2535_s1 }
0x15e3   :  { %v1886_v56 = vpop.permute.xlu0 %1885 }
0x15e4   :  { %v1891_v57 = vmul.f32 %v2449_v46, %v1886_v56 }
0x15e6   :  { %1905 = vrot.lane.b32.xlu0 %v1891_v57, %s2536_s6 }
0x15e7   :  { %v1888_v58 = vpop.permute.xlu1 %1887 }
0x15e8   :  { %v1892_v59 = vmul.f32 %v2451_v48, %v1888_v58 }
0x15ea   :  { %1907 = vrot.lane.b32.xlu1 %v1892_v59, %s2536_s6  ;;  %1895 = vrot.lane.b32.xlu0 %v1879_v12, %s2537_s7 }
0x15ee   :  { %1897 = vrot.lane.b32.xlu1 %v1880_v1, %s2537_s7 }
0x1658   :  { %v1906_v60 = vpop.permute.xlu0 %1905 }
0x1659   :  { %1911 = vst.msk [vmem:[#allocation2] sm:$0x3] %vm44_vm0, %v1906_v60  ;;  %1913 = vst.msk [vmem:[#allocation9 + $0xe] sm:$0x3] %vm44_vm0, %v1906_v60 }
0x165c   :  { %v1908_v61 = vpop.permute.xlu1 %1907  ;;  %v1896_v62 = vpop.permute.xlu0 %1895 }
0x165d   :  { %1912 = vst.msk [vmem:[#allocation2 + $0x2] sm:$0x3] %vm44_vm0, %v1908_v61  ;;  %1914 = vst.msk [vmem:[#allocation9 + $0x1e] sm:$0x3] %vm44_vm0, %v1908_v61 }
0x165e   :  { %1901 = vst.msk [vmem:[#allocation3] sm:$0x3] %vm44_vm0, %v1896_v62 }
0x165f   :  { %2511 = shalt.err (!%p2508_p6)
}
0x1660   :  { %s2512_s13 = scalar_lea.hbm %s2873_s2, 512 }
0x1661   :  { %p2513_p7 = scmp.ne.s32.totalorder %s2873_s2, %s2512_s13  ;;  %p2516_p8 = scmp.lt.u32.totalorder %s2512_s13, %s2873_s2 }
0x1663   :  { %p2518_p9 = pnand %p2516_p8, %p2513_p7 }
0x1665   :  { %2521 = shalt.err (!%p2518_p9)
}
0x1666   :  { %1926 = dma.vmem_to_hbm [thread:$0]  %s1921_s9, 512, %s2873_s2, [#allocation6], %s2529_s19, %s2529_s19, %s2530_s20   ;;  %v1898_v63 = vpop.permute.xlu1 %1897 }
0x1667   :  { %1902 = vst.msk [vmem:[#allocation3 + $0x2] sm:$0x3] %vm44_vm0, %v1898_v63 }
0x1668   :  { %2526 = dma.done.wait [#allocation6], 512  }
0x1669   :  { %2527 = vsyncadd [#allocation6], 4294966784 }
0x166a   :  { %1930 = vsyncpa [#allocation5], 1 }
0x166b   :  { %1931 = vsyncpa [#allocation8], 1 }
0x166c   :  { %1932 = vsyncpa [#allocation6], 1 }

</bundles_post_ra>
